<compile_context>
chip_gen: v6e
topology: v6e:2x2x1
jax: 0.10.0
libtpu: 0.0.40
codegen_flags: <defaults>
</compile_context>

<pallas_src>
import functools

import numpy as np
import jax
import jax.numpy as jnp
from jax.experimental import pallas as pl
from jax.experimental.pallas import tpu as pltpu

NEG_SLOPE = 0.01  # nn.LeakyReLU default negative slope

CONFIG = dict(
    latent_dim=8,
    output_dim=(16, 16),
    hidden_dim=((16, 16), (8, 8), (4,)),   # small analogue of [(128,128),(64,64),(32,)]
    output_channels=1,
)


# ----------------------------- in-kernel helpers ----------------------------

def _lrelu(v):
    return jnp.where(v >= 0, v, NEG_SLOPE * v)


def _write_padded(pad_ref, x2d, B, H, W, Cin):
    """Write x2d (B*H, W*Cin) into the interior of pad_ref (B, H+2, (W+2)*Cin)."""
    pad_ref[...] = jnp.zeros(pad_ref.shape, jnp.float32)
    for b in range(B):
        pad_ref[b, 1:H + 1, Cin:(W + 1) * Cin] = x2d[b * H:(b + 1) * H, :]


def _conv3x3_from_pad(pad_ref, w_ref, b_ref, B, H):
    """3x3 conv (stride 1, pad 1) + LeakyReLU from a padded VMEM scratch.

    Reads the 3 vertical taps, lane-concatenates them into a packed-K im2col slab
    (B*H, 3*(W+2)*Cin), then a single MXU matmul with the host-packed weight.
    """
    slabs = []
    for b in range(B):
        slabs.append(
            jnp.concatenate([pad_ref[b, dy:dy + H, :] for dy in range(3)], axis=1))
    xk = jnp.concatenate(slabs, axis=0) if B > 1 else slabs[0]
    y = jnp.dot(xk, w_ref[...], preferred_element_type=jnp.float32) + b_ref[...]
    return _lrelu(y)


def _upsample2x(x2d, mh_ref, mw_ref, B, H):
    """Exact bilinear x2 (align_corners=False) in the (B*H, W*C) layout."""
    xh = jnp.dot(x2d, mw_ref[...], preferred_element_type=jnp.float32)   # (B*H, 2W*C)
    mh = mh_ref[...]                                                     # (2H, H)
    ups = [jnp.dot(mh, xh[b * H:(b + 1) * H, :], preferred_element_type=jnp.float32)
           for b in range(B)]                                            # per batch: no kron(eye(B))
    return jnp.concatenate(ups, axis=0) if B > 1 else ups[0]             # (B*2H, 2W*C)


# --------------------------------- kernel -----------------------------------

def _decoder_kernel(*refs, B, hidden, h0, w0, c0):
    n_in = 3 + sum(2 * len(cb) + 4 for cb in hidden) + 2
    it = iter(refs[:n_in])
    o_ref = refs[n_in]
    pads = iter(refs[n_in + 1:])

    # ---- latent_to_features: Linear (columns pre-permuted to NHWC order) ----
    z_ref, fcw, fcb = next(it), next(it), next(it)
    feats = jnp.dot(z_ref[...], fcw[...], preferred_element_type=jnp.float32) + fcb[...]

    # scatter the fc features straight into the first conv's padded scratch
    H, W, Cin = h0, w0, c0
    pad = next(pads)
    pad[...] = jnp.zeros(pad.shape, jnp.float32)
    for b in range(B):
        for i in range(H):
            pad[b, 1 + i:2 + i, Cin:(W + 1) * Cin] = \
                feats[b:b + 1, i * W * Cin:(i + 1) * W * Cin]

    x = None
    first = True
    for cblock in hidden:
        # [conv3x3 + LeakyReLU] stack
        for cout in cblock:
            w_ref, b_ref = next(it), next(it)
            if not first:
                pad = next(pads)
                _write_padded(pad, x, B, H, W, Cin)
            first = False
            x = _conv3x3_from_pad(pad, w_ref, b_ref, B, H)      # (B*H, W*cout)
            Cin = cout
        # UpsampleBlock: 1x1 conv applied BEFORE bilinear x2 (they commute exactly)
        uw, ub = next(it), next(it)
        x = jnp.dot(x, uw[...], preferred_element_type=jnp.float32) + ub[...]
        mh, mw = next(it), next(it)
        x = _upsample2x(x, mh, mw, B, H)                        # (B*2H, 2W*Cin)
        H, W = 2 * H, 2 * W

    # ---- final 1x1 conv + sigmoid ----
    ow, ob = next(it), next(it)
    y = jnp.dot(x, ow[...], preferred_element_type=jnp.float32) + ob[...]  # (B*H, W*out_ch)
    y = pl.reciprocal(1.0 + jnp.exp(-y), approx=True)   # sigmoid: exp + rcp on the EUP
    y = jnp.minimum(y, 1.0)                             # approx rcp may overshoot 1 by an ulp

    # flatten to a lane-dense (B, H*W*out_ch) output (no narrow masked stores)
    rows = []
    for b in range(B):
        rows.append(jnp.concatenate(
            [y[b * H + i:b * H + i + 1, :] for i in range(H)], axis=1))
    o_ref[...] = jnp.concatenate(rows, axis=0) if B > 1 else rows[0]


# --------------------------- host-side weight packing -----------------------

def _interp_matrix(n_in):
    """PyTorch F.interpolate(scale=2, 'bilinear', align_corners=False) as (2n, n)."""
    n_out = 2 * n_in
    m = np.zeros((n_out, n_in), np.float32)
    for d in range(n_out):
        src = max((d + 0.5) * 0.5 - 0.5, 0.0)
        i0 = int(np.floor(src))
        i1 = min(i0 + 1, n_in - 1)
        l1 = src - i0
        m[d, i0] += 1.0 - l1
        m[d, i1] += l1
    return m


def _pack_conv3x3(w, W):
    """(3, 3, Cin, Cout) conv weight -> (3*(W+2)*Cin, W*Cout) packed-K matrix."""
    Cin, Cout = w.shape[2], w.shape[3]
    Lp = (W + 2) * Cin
    wp = np.zeros((3 * Lp, W * Cout), np.float32)
    for dy in range(3):
        for dx in range(3):
            for j in range(W):
                r0 = dy * Lp + (j + dx) * Cin
                wp[r0:r0 + Cin, j * Cout:(j + 1) * Cout] = w[dy, dx]
    return wp


def pack_params(params):
    """Convert raw (PyTorch-layout) weights into the kernel's matmul operands."""
    hidden = CONFIG["hidden_dim"]
    nup = len(hidden)
    h0 = CONFIG["output_dim"][0] // (2 ** nup)
    w0 = CONFIG["output_dim"][1] // (2 ** nup)
    c0 = hidden[0][0]

    ops = []

    # fc: permute output columns from NCHW-flat (c, i, j) to NHWC-flat (i, j, c)
    fc_w = np.asarray(params["fc_w"], np.float32)
    fc_b = np.asarray(params["fc_b"], np.float32)
    perm = np.array([c * h0 * w0 + i * w0 + j
                     for i in range(h0) for j in range(w0) for c in range(c0)])
    ops += [fc_w[:, perm], fc_b[perm].reshape(1, -1)]

    H, W = h0, w0
    for block in params["blocks"]:
        for (w, b) in block["convs"]:
            w = np.asarray(w, np.float32)
            ops += [_pack_conv3x3(w, W),
                    np.tile(np.asarray(b, np.float32), W).reshape(1, -1)]
        upw = np.asarray(block["up_w"], np.float32)
        upb = np.asarray(block["up_b"], np.float32)
        C = upw.shape[1]
        ops += [np.kron(np.eye(W, dtype=np.float32), upw),      # 1x1 conv as block-diag
                np.tile(upb, W).reshape(1, -1)]
        ops += [_interp_matrix(H),                               # vertical interp (2H, H)
                np.kron(_interp_matrix(W),
                        np.eye(C, dtype=np.float32)).T]          # horizontal (W*C, 2W*C)
        H, W = 2 * H, 2 * W

    ow = np.asarray(params["out_w"], np.float32)
    ob = np.asarray(params["out_b"], np.float32)
    ops += [np.kron(np.eye(W, dtype=np.float32), ow),
            np.tile(ob, W).reshape(1, -1)]
    return tuple(jnp.asarray(a) for a in ops)


# ------------------------------ pallas_call builder --------------------------

def build_decoder(B):
    hidden = CONFIG["hidden_dim"]
    out_ch = CONFIG["output_channels"]
    ld = CONFIG["latent_dim"]
    nup = len(hidden)
    h0 = CONFIG["output_dim"][0] // (2 ** nup)
    w0 = CONFIG["output_dim"][1] // (2 ** nup)
    c0 = hidden[0][0]
    Hf, Wf = CONFIG["output_dim"]

    in_shapes = [(B, ld), (ld, c0 * h0 * w0), (1, c0 * h0 * w0)]
    scratch = []
    H, W, Cin = h0, w0, c0
    for cblock in hidden:
        for cout in cblock:
            scratch.append(pltpu.VMEM((B, H + 2, (W + 2) * Cin), jnp.float32))
            in_shapes += [(3 * (W + 2) * Cin, W * cout), (1, W * cout)]
            Cin = cout
        in_shapes += [(W * Cin, W * Cin), (1, W * Cin)]       # 1x1 conv (block-diag)
        in_shapes += [(2 * H, H), (W * Cin, 2 * W * Cin)]     # vertical / horizontal interp
        H, W = 2 * H, 2 * W
    in_shapes += [(W * Cin, W * out_ch), (1, W * out_ch)]     # final 1x1

    kernel = functools.partial(_decoder_kernel, B=B, hidden=hidden,
                               h0=h0, w0=w0, c0=c0)
    return pl.pallas_call(
        kernel,
        out_shape=jax.ShapeDtypeStruct((B, Hf * Wf * out_ch), jnp.float32),
        grid=(1,),
        in_specs=[pl.BlockSpec(s, lambda i: (0, 0)) for s in in_shapes],
        out_specs=pl.BlockSpec((B, Hf * Wf * out_ch), lambda i: (0, 0)),
        scratch_shapes=scratch,
        compiler_params=pltpu.CompilerParams(dimension_semantics=("arbitrary",)),
    )


# ------------------------------ parameters ----------------------------------

def init_params(key):
    ld = CONFIG["latent_dim"]
    hidden = CONFIG["hidden_dim"]
    out_ch = CONFIG["output_channels"]
    nup = len(hidden)
    h0 = CONFIG["output_dim"][0] // (2 ** nup)
    w0 = CONFIG["output_dim"][1] // (2 ** nup)
    c0 = hidden[0][0]

    keys = iter(jax.random.split(key, 64))

    def lin_init(k, fin, fout):
        kw, kb = jax.random.split(k)
        w = jax.random.normal(kw, (fin, fout), jnp.float32) / np.sqrt(fin)
        b = 0.01 * jax.random.normal(kb, (fout,), jnp.float32)
        return w, b

    def conv3_init(k, cin, cout):
        kw, kb = jax.random.split(k)
        w = jax.random.normal(kw, (3, 3, cin, cout), jnp.float32) / np.sqrt(9 * cin)
        b = 0.01 * jax.random.normal(kb, (cout,), jnp.float32)
        return w, b

    params = {}
    params["fc_w"], params["fc_b"] = lin_init(next(keys), ld, c0 * h0 * w0)

    blocks = []
    ch_in = c0
    ch = c0
    for cblock in hidden:
        convs = []
        for ch in cblock:
            convs.append(conv3_init(next(keys), ch_in, ch))
            ch_in = ch
        up_w, up_b = lin_init(next(keys), ch, ch)    # UpsampleBlock 1x1 conv (ch -> ch)
        blocks.append({"convs": convs, "up_w": up_w, "up_b": up_b})
    params["blocks"] = blocks
    params["out_w"], params["out_b"] = lin_init(next(keys), ch, out_ch)
    return params


# --------------------------------- main --------------------------------------

if __name__ == "__main__":
    key = jax.random.PRNGKey(0)
    k_params, k_in = jax.random.split(key)

    params = init_params(k_params)
    packed = pack_params(params)

    B = 2
    z = jax.random.normal(k_in, (B, CONFIG["latent_dim"]), jnp.float32)

    decoder_call = build_decoder(B)
    Hf, Wf = CONFIG["output_dim"]
    out_ch = CONFIG["output_channels"]

    @jax.jit
    def forward(z, *packed_weights):
        flat = decoder_call(z, *packed_weights)                 # (B, Hf*Wf*out_ch), NHWC-flat
        return flat.reshape(B, Hf, Wf, out_ch).transpose(0, 3, 1, 2)   # NCHW like PyTorch

    out = jax.block_until_ready(forward(z, *packed))

    expected = (B, out_ch, Hf, Wf)
    assert out.shape == expected, f"bad shape {out.shape} vs {expected}"
    assert bool(jnp.all(jnp.isfinite(out)))
    assert bool(jnp.all((out >= 0.0) & (out <= 1.0)))  # sigmoid output range
    print("KERNEL_OK")
</pallas_src>

<mosaic_0001>
module attributes {stable_mosaic.version = 11 : i64} {
  func.func @_decoder_kernel(%arg0: i32, %arg1: memref<2x8xf32, #tpu.memory_space<vmem>>, %arg2: memref<8x64xf32, #tpu.memory_space<vmem>>, %arg3: memref<1x64xf32, #tpu.memory_space<vmem>>, %arg4: memref<192x32xf32, #tpu.memory_space<vmem>>, %arg5: memref<1x32xf32, #tpu.memory_space<vmem>>, %arg6: memref<192x32xf32, #tpu.memory_space<vmem>>, %arg7: memref<1x32xf32, #tpu.memory_space<vmem>>, %arg8: memref<32x32xf32, #tpu.memory_space<vmem>>, %arg9: memref<1x32xf32, #tpu.memory_space<vmem>>, %arg10: memref<4x2xf32, #tpu.memory_space<vmem>>, %arg11: memref<32x64xf32, #tpu.memory_space<vmem>>, %arg12: memref<288x32xf32, #tpu.memory_space<vmem>>, %arg13: memref<1x32xf32, #tpu.memory_space<vmem>>, %arg14: memref<144x32xf32, #tpu.memory_space<vmem>>, %arg15: memref<1x32xf32, #tpu.memory_space<vmem>>, %arg16: memref<32x32xf32, #tpu.memory_space<vmem>>, %arg17: memref<1x32xf32, #tpu.memory_space<vmem>>, %arg18: memref<8x4xf32, #tpu.memory_space<vmem>>, %arg19: memref<32x64xf32, #tpu.memory_space<vmem>>, %arg20: memref<240x32xf32, #tpu.memory_space<vmem>>, %arg21: memref<1x32xf32, #tpu.memory_space<vmem>>, %arg22: memref<32x32xf32, #tpu.memory_space<vmem>>, %arg23: memref<1x32xf32, #tpu.memory_space<vmem>>, %arg24: memref<16x8xf32, #tpu.memory_space<vmem>>, %arg25: memref<32x64xf32, #tpu.memory_space<vmem>>, %arg26: memref<64x16xf32, #tpu.memory_space<vmem>>, %arg27: memref<1x16xf32, #tpu.memory_space<vmem>>, %arg28: memref<2x256xf32, #tpu.memory_space<vmem>>, %arg29: memref<2x4x64xf32, #tpu.memory_space<vmem>>, %arg30: memref<2x4x64xf32, #tpu.memory_space<vmem>>, %arg31: memref<2x6x96xf32, #tpu.memory_space<vmem>>, %arg32: memref<2x6x48xf32, #tpu.memory_space<vmem>>, %arg33: memref<2x10x80xf32, #tpu.memory_space<vmem>>) attributes {dimension_semantics = [#tpu.dimension_semantics<arbitrary>], iteration_bounds = array<i64: 1>, scalar_prefetch = 0 : i64, scratch_operands = 5 : i64, tpu.core_type = #tpu.core_type<tc>, window_params = [{pipeline_mode = #tpu.pipeline_mode<synchronous>, transform_indices = @transform_0, window_bounds = array<i64: 2, 8>}, {pipeline_mode = #tpu.pipeline_mode<synchronous>, transform_indices = @transform_1, window_bounds = array<i64: 8, 64>}, {pipeline_mode = #tpu.pipeline_mode<synchronous>, transform_indices = @transform_2, window_bounds = array<i64: 1, 64>}, {pipeline_mode = #tpu.pipeline_mode<synchronous>, transform_indices = @transform_3, window_bounds = array<i64: 192, 32>}, {pipeline_mode = #tpu.pipeline_mode<synchronous>, transform_indices = @transform_4, window_bounds = array<i64: 1, 32>}, {pipeline_mode = #tpu.pipeline_mode<synchronous>, transform_indices = @transform_5, window_bounds = array<i64: 192, 32>}, {pipeline_mode = #tpu.pipeline_mode<synchronous>, transform_indices = @transform_6, window_bounds = array<i64: 1, 32>}, {pipeline_mode = #tpu.pipeline_mode<synchronous>, transform_indices = @transform_7, window_bounds = array<i64: 32, 32>}, {pipeline_mode = #tpu.pipeline_mode<synchronous>, transform_indices = @transform_8, window_bounds = array<i64: 1, 32>}, {pipeline_mode = #tpu.pipeline_mode<synchronous>, transform_indices = @transform_9, window_bounds = array<i64: 4, 2>}, {pipeline_mode = #tpu.pipeline_mode<synchronous>, transform_indices = @transform_10, window_bounds = array<i64: 32, 64>}, {pipeline_mode = #tpu.pipeline_mode<synchronous>, transform_indices = @transform_11, window_bounds = array<i64: 288, 32>}, {pipeline_mode = #tpu.pipeline_mode<synchronous>, transform_indices = @transform_12, window_bounds = array<i64: 1, 32>}, {pipeline_mode = #tpu.pipeline_mode<synchronous>, transform_indices = @transform_13, window_bounds = array<i64: 144, 32>}, {pipeline_mode = #tpu.pipeline_mode<synchronous>, transform_indices = @transform_14, window_bounds = array<i64: 1, 32>}, {pipeline_mode = #tpu.pipeline_mode<synchronous>, transform_indices = @transform_15, window_bounds = array<i64: 32, 32>}, {pipeline_mode = #tpu.pipeline_mode<synchronous>, transform_indices = @transform_16, window_bounds = array<i64: 1, 32>}, {pipeline_mode = #tpu.pipeline_mode<synchronous>, transform_indices = @transform_17, window_bounds = array<i64: 8, 4>}, {pipeline_mode = #tpu.pipeline_mode<synchronous>, transform_indices = @transform_18, window_bounds = array<i64: 32, 64>}, {pipeline_mode = #tpu.pipeline_mode<synchronous>, transform_indices = @transform_19, window_bounds = array<i64: 240, 32>}, {pipeline_mode = #tpu.pipeline_mode<synchronous>, transform_indices = @transform_20, window_bounds = array<i64: 1, 32>}, {pipeline_mode = #tpu.pipeline_mode<synchronous>, transform_indices = @transform_21, window_bounds = array<i64: 32, 32>}, {pipeline_mode = #tpu.pipeline_mode<synchronous>, transform_indices = @transform_22, window_bounds = array<i64: 1, 32>}, {pipeline_mode = #tpu.pipeline_mode<synchronous>, transform_indices = @transform_23, window_bounds = array<i64: 16, 8>}, {pipeline_mode = #tpu.pipeline_mode<synchronous>, transform_indices = @transform_24, window_bounds = array<i64: 32, 64>}, {pipeline_mode = #tpu.pipeline_mode<synchronous>, transform_indices = @transform_25, window_bounds = array<i64: 64, 16>}, {pipeline_mode = #tpu.pipeline_mode<synchronous>, transform_indices = @transform_26, window_bounds = array<i64: 1, 16>}, {pipeline_mode = #tpu.pipeline_mode<synchronous>, transform_indices = @transform_27, window_bounds = array<i64: 2, 256>}]} {
    %c0 = arith.constant 0 : index
    %c0_0 = arith.constant 0 : index
    %0 = vector.load %arg1[%c0, %c0_0] : memref<2x8xf32, #tpu.memory_space<vmem>>, vector<2x8xf32>
    %c0_1 = arith.constant 0 : index
    %c0_2 = arith.constant 0 : index
    %1 = vector.load %arg2[%c0_1, %c0_2] : memref<8x64xf32, #tpu.memory_space<vmem>>, vector<8x64xf32>
    %cst = arith.constant dense<0.000000e+00> : vector<2x64xf32>
    %2 = tpu.matmul %0, %1, %cst {dimension_numbers = #tpu.dot_dimension_numbers<[1], [0], [0], [1], [0, 0, 1, 1], [], []>} : vector<2x8xf32>, vector<8x64xf32>, vector<2x64xf32> -> vector<2x64xf32>
    %c0_3 = arith.constant 0 : index
    %c0_4 = arith.constant 0 : index
    %3 = vector.load %arg3[%c0_3, %c0_4] : memref<1x64xf32, #tpu.memory_space<vmem>>, vector<1x64xf32>
    %4 = vector.broadcast %3 : vector<1x64xf32> to vector<2x64xf32>
    %5 = arith.addf %2, %4 : vector<2x64xf32>
    %cst_5 = arith.constant 0.000000e+00 : f32
    %6 = vector.broadcast %cst_5 : f32 to vector<2x4x64xf32>
    %c0_6 = arith.constant 0 : index
    %c0_7 = arith.constant 0 : index
    %c0_8 = arith.constant 0 : index
    %7 = vector.load %arg29[%c0_6, %c0_7, %c0_8] : memref<2x4x64xf32, #tpu.memory_space<vmem>>, vector<2x4x64xf32>
    tpu.vector_store %arg29[%c0_6, %c0_7, %c0_8], %6 {strides = array<i32>} : memref<2x4x64xf32, #tpu.memory_space<vmem>>, vector<2x4x64xf32>,
    %8 = vector.extract_strided_slice %5 {offsets = [0, 0], sizes = [1, 32], strides = [1, 1]} : vector<2x64xf32> to vector<1x32xf32>
    %c0_9 = arith.constant 0 : index
    %c1 = arith.constant 1 : index
    %c16 = arith.constant 16 : index
    %9 = vector.load %arg29[%c0_9, %c1, %c16] : memref<2x4x64xf32, #tpu.memory_space<vmem>>, vector<1x1x32xf32>
    %10 = vector.shape_cast %9 : vector<1x1x32xf32> to vector<1x32xf32>
    %11 = vector.shape_cast %8 : vector<1x32xf32> to vector<1x1x32xf32>
    tpu.vector_store %arg29[%c0_9, %c1, %c16], %11 {strides = array<i32>} : memref<2x4x64xf32, #tpu.memory_space<vmem>>, vector<1x1x32xf32>,
    %12 = vector.extract_strided_slice %5 {offsets = [0, 32], sizes = [1, 32], strides = [1, 1]} : vector<2x64xf32> to vector<1x32xf32>
    %c0_10 = arith.constant 0 : index
    %c2 = arith.constant 2 : index
    %c16_11 = arith.constant 16 : index
    %13 = vector.load %arg29[%c0_10, %c2, %c16_11] : memref<2x4x64xf32, #tpu.memory_space<vmem>>, vector<1x1x32xf32>
    %14 = vector.shape_cast %13 : vector<1x1x32xf32> to vector<1x32xf32>
    %15 = vector.shape_cast %12 : vector<1x32xf32> to vector<1x1x32xf32>
    tpu.vector_store %arg29[%c0_10, %c2, %c16_11], %15 {strides = array<i32>} : memref<2x4x64xf32, #tpu.memory_space<vmem>>, vector<1x1x32xf32>,
    %16 = vector.extract_strided_slice %5 {offsets = [1, 0], sizes = [1, 32], strides = [1, 1]} : vector<2x64xf32> to vector<1x32xf32>
    %c1_12 = arith.constant 1 : index
    %c1_13 = arith.constant 1 : index
    %c16_14 = arith.constant 16 : index
    %17 = vector.load %arg29[%c1_12, %c1_13, %c16_14] : memref<2x4x64xf32, #tpu.memory_space<vmem>>, vector<1x1x32xf32>
    %18 = vector.shape_cast %17 : vector<1x1x32xf32> to vector<1x32xf32>
    %19 = vector.shape_cast %16 : vector<1x32xf32> to vector<1x1x32xf32>
    tpu.vector_store %arg29[%c1_12, %c1_13, %c16_14], %19 {strides = array<i32>} : memref<2x4x64xf32, #tpu.memory_space<vmem>>, vector<1x1x32xf32>,
    %20 = vector.extract_strided_slice %5 {offsets = [1, 32], sizes = [1, 32], strides = [1, 1]} : vector<2x64xf32> to vector<1x32xf32>
    %c1_15 = arith.constant 1 : index
    %c2_16 = arith.constant 2 : index
    %c16_17 = arith.constant 16 : index
    %21 = vector.load %arg29[%c1_15, %c2_16, %c16_17] : memref<2x4x64xf32, #tpu.memory_space<vmem>>, vector<1x1x32xf32>
    %22 = vector.shape_cast %21 : vector<1x1x32xf32> to vector<1x32xf32>
    %23 = vector.shape_cast %20 : vector<1x32xf32> to vector<1x1x32xf32>
    tpu.vector_store %arg29[%c1_15, %c2_16, %c16_17], %23 {strides = array<i32>} : memref<2x4x64xf32, #tpu.memory_space<vmem>>, vector<1x1x32xf32>,
    %c0_18 = arith.constant 0 : index
    %c0_19 = arith.constant 0 : index
    %c0_20 = arith.constant 0 : index
    %24 = vector.load %arg29[%c0_18, %c0_19, %c0_20] : memref<2x4x64xf32, #tpu.memory_space<vmem>>, vector<1x2x64xf32>
    %25 = vector.shape_cast %24 : vector<1x2x64xf32> to vector<2x64xf32>
    %c0_21 = arith.constant 0 : index
    %c1_22 = arith.constant 1 : index
    %c0_23 = arith.constant 0 : index
    %26 = vector.load %arg29[%c0_21, %c1_22, %c0_23] : memref<2x4x64xf32, #tpu.memory_space<vmem>>, vector<1x2x64xf32>
    %27 = vector.shape_cast %26 : vector<1x2x64xf32> to vector<2x64xf32>
    %c0_24 = arith.constant 0 : index
    %c2_25 = arith.constant 2 : index
    %c0_26 = arith.constant 0 : index
    %28 = vector.load %arg29[%c0_24, %c2_25, %c0_26] : memref<2x4x64xf32, #tpu.memory_space<vmem>>, vector<1x2x64xf32>
    %29 = vector.shape_cast %28 : vector<1x2x64xf32> to vector<2x64xf32>
    %30 = tpu.concatenate %25, %27, %29 in 1 : vector<2x64xf32>, vector<2x64xf32>, vector<2x64xf32> -> vector<2x192xf32>
    %c1_27 = arith.constant 1 : index
    %c0_28 = arith.constant 0 : index
    %c0_29 = arith.constant 0 : index
    %31 = vector.load %arg29[%c1_27, %c0_28, %c0_29] : memref<2x4x64xf32, #tpu.memory_space<vmem>>, vector<1x2x64xf32>
    %32 = vector.shape_cast %31 : vector<1x2x64xf32> to vector<2x64xf32>
    %c1_30 = arith.constant 1 : index
    %c1_31 = arith.constant 1 : index
    %c0_32 = arith.constant 0 : index
    %33 = vector.load %arg29[%c1_30, %c1_31, %c0_32] : memref<2x4x64xf32, #tpu.memory_space<vmem>>, vector<1x2x64xf32>
    %34 = vector.shape_cast %33 : vector<1x2x64xf32> to vector<2x64xf32>
    %c1_33 = arith.constant 1 : index
    %c2_34 = arith.constant 2 : index
    %c0_35 = arith.constant 0 : index
    %35 = vector.load %arg29[%c1_33, %c2_34, %c0_35] : memref<2x4x64xf32, #tpu.memory_space<vmem>>, vector<1x2x64xf32>
    %36 = vector.shape_cast %35 : vector<1x2x64xf32> to vector<2x64xf32>
    %37 = tpu.concatenate %32, %34, %36 in 1 : vector<2x64xf32>, vector<2x64xf32>, vector<2x64xf32> -> vector<2x192xf32>
    %38 = tpu.concatenate %30, %37 in 0 : vector<2x192xf32>, vector<2x192xf32> -> vector<4x192xf32>
    %c0_36 = arith.constant 0 : index
    %c0_37 = arith.constant 0 : index
    %39 = vector.load %arg4[%c0_36, %c0_37] : memref<192x32xf32, #tpu.memory_space<vmem>>, vector<192x32xf32>
    %cst_38 = arith.constant dense<0.000000e+00> : vector<4x32xf32>
    %40 = tpu.matmul %38, %39, %cst_38 {dimension_numbers = #tpu.dot_dimension_numbers<[1], [0], [0], [1], [0, 0, 1, 1], [], []>} : vector<4x192xf32>, vector<192x32xf32>, vector<4x32xf32> -> vector<4x32xf32>
    %c0_39 = arith.constant 0 : index
    %c0_40 = arith.constant 0 : index
    %41 = vector.load %arg5[%c0_39, %c0_40] : memref<1x32xf32, #tpu.memory_space<vmem>>, vector<1x32xf32>
    %42 = vector.broadcast %41 : vector<1x32xf32> to vector<4x32xf32>
    %43 = arith.addf %40, %42 : vector<4x32xf32>
    %cst_41 = arith.constant 0.000000e+00 : f32
    %44 = vector.broadcast %cst_41 : f32 to vector<4x32xf32>
    %45 = arith.cmpf oge, %43, %44 : vector<4x32xf32>
    %cst_42 = arith.constant 0.00999999977 : f32
    %46 = vector.broadcast %cst_42 : f32 to vector<4x32xf32>
    %47 = arith.mulf %46, %43 : vector<4x32xf32>
    %48 = arith.select %45, %43, %47 : vector<4x32xi1>, vector<4x32xf32>
    %cst_43 = arith.constant 0.000000e+00 : f32
    %49 = vector.broadcast %cst_43 : f32 to vector<2x4x64xf32>
    %c0_44 = arith.constant 0 : index
    %c0_45 = arith.constant 0 : index
    %c0_46 = arith.constant 0 : index
    %50 = vector.load %arg30[%c0_44, %c0_45, %c0_46] : memref<2x4x64xf32, #tpu.memory_space<vmem>>, vector<2x4x64xf32>
    tpu.vector_store %arg30[%c0_44, %c0_45, %c0_46], %49 {strides = array<i32>} : memref<2x4x64xf32, #tpu.memory_space<vmem>>, vector<2x4x64xf32>,
    %51 = vector.extract_strided_slice %48 {offsets = [0, 0], sizes = [2, 32], strides = [1, 1]} : vector<4x32xf32> to vector<2x32xf32>
    %c0_47 = arith.constant 0 : index
    %c1_48 = arith.constant 1 : index
    %c16_49 = arith.constant 16 : index
    %52 = vector.load %arg30[%c0_47, %c1_48, %c16_49] : memref<2x4x64xf32, #tpu.memory_space<vmem>>, vector<1x2x32xf32>
    %53 = vector.shape_cast %52 : vector<1x2x32xf32> to vector<2x32xf32>
    %54 = vector.shape_cast %51 : vector<2x32xf32> to vector<1x2x32xf32>
    tpu.vector_store %arg30[%c0_47, %c1_48, %c16_49], %54 {strides = array<i32>} : memref<2x4x64xf32, #tpu.memory_space<vmem>>, vector<1x2x32xf32>,
    %55 = vector.extract_strided_slice %48 {offsets = [2, 0], sizes = [2, 32], strides = [1, 1]} : vector<4x32xf32> to vector<2x32xf32>
    %c1_50 = arith.constant 1 : index
    %c1_51 = arith.constant 1 : index
    %c16_52 = arith.constant 16 : index
    %56 = vector.load %arg30[%c1_50, %c1_51, %c16_52] : memref<2x4x64xf32, #tpu.memory_space<vmem>>, vector<1x2x32xf32>
    %57 = vector.shape_cast %56 : vector<1x2x32xf32> to vector<2x32xf32>
    %58 = vector.shape_cast %55 : vector<2x32xf32> to vector<1x2x32xf32>
    tpu.vector_store %arg30[%c1_50, %c1_51, %c16_52], %58 {strides = array<i32>} : memref<2x4x64xf32, #tpu.memory_space<vmem>>, vector<1x2x32xf32>,
    %c0_53 = arith.constant 0 : index
    %c0_54 = arith.constant 0 : index
    %c0_55 = arith.constant 0 : index
    %59 = vector.load %arg30[%c0_53, %c0_54, %c0_55] : memref<2x4x64xf32, #tpu.memory_space<vmem>>, vector<1x2x64xf32>
    %60 = vector.shape_cast %59 : vector<1x2x64xf32> to vector<2x64xf32>
    %c0_56 = arith.constant 0 : index
    %c1_57 = arith.constant 1 : index
    %c0_58 = arith.constant 0 : index
    %61 = vector.load %arg30[%c0_56, %c1_57, %c0_58] : memref<2x4x64xf32, #tpu.memory_space<vmem>>, vector<1x2x64xf32>
    %62 = vector.shape_cast %61 : vector<1x2x64xf32> to vector<2x64xf32>
    %c0_59 = arith.constant 0 : index
    %c2_60 = arith.constant 2 : index
    %c0_61 = arith.constant 0 : index
    %63 = vector.load %arg30[%c0_59, %c2_60, %c0_61] : memref<2x4x64xf32, #tpu.memory_space<vmem>>, vector<1x2x64xf32>
    %64 = vector.shape_cast %63 : vector<1x2x64xf32> to vector<2x64xf32>
    %65 = tpu.concatenate %60, %62, %64 in 1 : vector<2x64xf32>, vector<2x64xf32>, vector<2x64xf32> -> vector<2x192xf32>
    %c1_62 = arith.constant 1 : index
    %c0_63 = arith.constant 0 : index
    %c0_64 = arith.constant 0 : index
    %66 = vector.load %arg30[%c1_62, %c0_63, %c0_64] : memref<2x4x64xf32, #tpu.memory_space<vmem>>, vector<1x2x64xf32>
    %67 = vector.shape_cast %66 : vector<1x2x64xf32> to vector<2x64xf32>
    %c1_65 = arith.constant 1 : index
    %c1_66 = arith.constant 1 : index
    %c0_67 = arith.constant 0 : index
    %68 = vector.load %arg30[%c1_65, %c1_66, %c0_67] : memref<2x4x64xf32, #tpu.memory_space<vmem>>, vector<1x2x64xf32>
    %69 = vector.shape_cast %68 : vector<1x2x64xf32> to vector<2x64xf32>
    %c1_68 = arith.constant 1 : index
    %c2_69 = arith.constant 2 : index
    %c0_70 = arith.constant 0 : index
    %70 = vector.load %arg30[%c1_68, %c2_69, %c0_70] : memref<2x4x64xf32, #tpu.memory_space<vmem>>, vector<1x2x64xf32>
    %71 = vector.shape_cast %70 : vector<1x2x64xf32> to vector<2x64xf32>
    %72 = tpu.concatenate %67, %69, %71 in 1 : vector<2x64xf32>, vector<2x64xf32>, vector<2x64xf32> -> vector<2x192xf32>
    %73 = tpu.concatenate %65, %72 in 0 : vector<2x192xf32>, vector<2x192xf32> -> vector<4x192xf32>
    %c0_71 = arith.constant 0 : index
    %c0_72 = arith.constant 0 : index
    %74 = vector.load %arg6[%c0_71, %c0_72] : memref<192x32xf32, #tpu.memory_space<vmem>>, vector<192x32xf32>
    %cst_73 = arith.constant dense<0.000000e+00> : vector<4x32xf32>
    %75 = tpu.matmul %73, %74, %cst_73 {dimension_numbers = #tpu.dot_dimension_numbers<[1], [0], [0], [1], [0, 0, 1, 1], [], []>} : vector<4x192xf32>, vector<192x32xf32>, vector<4x32xf32> -> vector<4x32xf32>
    %c0_74 = arith.constant 0 : index
    %c0_75 = arith.constant 0 : index
    %76 = vector.load %arg7[%c0_74, %c0_75] : memref<1x32xf32, #tpu.memory_space<vmem>>, vector<1x32xf32>
    %77 = vector.broadcast %76 : vector<1x32xf32> to vector<4x32xf32>
    %78 = arith.addf %75, %77 : vector<4x32xf32>
    %cst_76 = arith.constant 0.000000e+00 : f32
    %79 = vector.broadcast %cst_76 : f32 to vector<4x32xf32>
    %80 = arith.cmpf oge, %78, %79 : vector<4x32xf32>
    %cst_77 = arith.constant 0.00999999977 : f32
    %81 = vector.broadcast %cst_77 : f32 to vector<4x32xf32>
    %82 = arith.mulf %81, %78 : vector<4x32xf32>
    %83 = arith.select %80, %78, %82 : vector<4x32xi1>, vector<4x32xf32>
    %c0_78 = arith.constant 0 : index
    %c0_79 = arith.constant 0 : index
    %84 = vector.load %arg8[%c0_78, %c0_79] : memref<32x32xf32, #tpu.memory_space<vmem>>, vector<32x32xf32>
    %cst_80 = arith.constant dense<0.000000e+00> : vector<4x32xf32>
    %85 = tpu.matmul %83, %84, %cst_80 {dimension_numbers = #tpu.dot_dimension_numbers<[1], [0], [0], [1], [0, 0, 1, 1], [], []>} : vector<4x32xf32>, vector<32x32xf32>, vector<4x32xf32> -> vector<4x32xf32>
    %c0_81 = arith.constant 0 : index
    %c0_82 = arith.constant 0 : index
    %86 = vector.load %arg9[%c0_81, %c0_82] : memref<1x32xf32, #tpu.memory_space<vmem>>, vector<1x32xf32>
    %87 = vector.broadcast %86 : vector<1x32xf32> to vector<4x32xf32>
    %88 = arith.addf %85, %87 : vector<4x32xf32>
    %c0_83 = arith.constant 0 : index
    %c0_84 = arith.constant 0 : index
    %89 = vector.load %arg11[%c0_83, %c0_84] : memref<32x64xf32, #tpu.memory_space<vmem>>, vector<32x64xf32>
    %cst_85 = arith.constant dense<0.000000e+00> : vector<4x64xf32>
    %90 = tpu.matmul %88, %89, %cst_85 {dimension_numbers = #tpu.dot_dimension_numbers<[1], [0], [0], [1], [0, 0, 1, 1], [], []>} : vector<4x32xf32>, vector<32x64xf32>, vector<4x64xf32> -> vector<4x64xf32>
    %c0_86 = arith.constant 0 : index
    %c0_87 = arith.constant 0 : index
    %91 = vector.load %arg10[%c0_86, %c0_87] : memref<4x2xf32, #tpu.memory_space<vmem>>, vector<4x2xf32>
    %92 = vector.extract_strided_slice %90 {offsets = [0, 0], sizes = [2, 64], strides = [1, 1]} : vector<4x64xf32> to vector<2x64xf32>
    %cst_88 = arith.constant dense<0.000000e+00> : vector<4x64xf32>
    %93 = tpu.matmul %91, %92, %cst_88 {dimension_numbers = #tpu.dot_dimension_numbers<[1], [0], [0], [1], [0, 0, 1, 1], [], []>} : vector<4x2xf32>, vector<2x64xf32>, vector<4x64xf32> -> vector<4x64xf32>
    %94 = vector.extract_strided_slice %90 {offsets = [2, 0], sizes = [2, 64], strides = [1, 1]} : vector<4x64xf32> to vector<2x64xf32>
    %cst_89 = arith.constant dense<0.000000e+00> : vector<4x64xf32>
    %95 = tpu.matmul %91, %94, %cst_89 {dimension_numbers = #tpu.dot_dimension_numbers<[1], [0], [0], [1], [0, 0, 1, 1], [], []>} : vector<4x2xf32>, vector<2x64xf32>, vector<4x64xf32> -> vector<4x64xf32>
    %96 = tpu.concatenate %93, %95 in 0 : vector<4x64xf32>, vector<4x64xf32> -> vector<8x64xf32>
    %cst_90 = arith.constant 0.000000e+00 : f32
    %97 = vector.broadcast %cst_90 : f32 to vector<2x6x96xf32>
    %c0_91 = arith.constant 0 : index
    %c0_92 = arith.constant 0 : index
    %c0_93 = arith.constant 0 : index
    %98 = vector.load %arg31[%c0_91, %c0_92, %c0_93] : memref<2x6x96xf32, #tpu.memory_space<vmem>>, vector<2x6x96xf32>
    tpu.vector_store %arg31[%c0_91, %c0_92, %c0_93], %97 {strides = array<i32>} : memref<2x6x96xf32, #tpu.memory_space<vmem>>, vector<2x6x96xf32>,
    %99 = vector.extract_strided_slice %96 {offsets = [0, 0], sizes = [4, 64], strides = [1, 1]} : vector<8x64xf32> to vector<4x64xf32>
    %c0_94 = arith.constant 0 : index
    %c1_95 = arith.constant 1 : index
    %c16_96 = arith.constant 16 : index
    %100 = vector.load %arg31[%c0_94, %c1_95, %c16_96] : memref<2x6x96xf32, #tpu.memory_space<vmem>>, vector<1x4x64xf32>
    %101 = vector.shape_cast %100 : vector<1x4x64xf32> to vector<4x64xf32>
    %102 = vector.shape_cast %99 : vector<4x64xf32> to vector<1x4x64xf32>
    tpu.vector_store %arg31[%c0_94, %c1_95, %c16_96], %102 {strides = array<i32>} : memref<2x6x96xf32, #tpu.memory_space<vmem>>, vector<1x4x64xf32>,
    %103 = vector.extract_strided_slice %96 {offsets = [4, 0], sizes = [4, 64], strides = [1, 1]} : vector<8x64xf32> to vector<4x64xf32>
    %c1_97 = arith.constant 1 : index
    %c1_98 = arith.constant 1 : index
    %c16_99 = arith.constant 16 : index
    %104 = vector.load %arg31[%c1_97, %c1_98, %c16_99] : memref<2x6x96xf32, #tpu.memory_space<vmem>>, vector<1x4x64xf32>
    %105 = vector.shape_cast %104 : vector<1x4x64xf32> to vector<4x64xf32>
    %106 = vector.shape_cast %103 : vector<4x64xf32> to vector<1x4x64xf32>
    tpu.vector_store %arg31[%c1_97, %c1_98, %c16_99], %106 {strides = array<i32>} : memref<2x6x96xf32, #tpu.memory_space<vmem>>, vector<1x4x64xf32>,
    %c0_100 = arith.constant 0 : index
    %c0_101 = arith.constant 0 : index
    %c0_102 = arith.constant 0 : index
    %107 = vector.load %arg31[%c0_100, %c0_101, %c0_102] : memref<2x6x96xf32, #tpu.memory_space<vmem>>, vector<1x4x96xf32>
    %108 = vector.shape_cast %107 : vector<1x4x96xf32> to vector<4x96xf32>
    %c0_103 = arith.constant 0 : index
    %c1_104 = arith.constant 1 : index
    %c0_105 = arith.constant 0 : index
    %109 = vector.load %arg31[%c0_103, %c1_104, %c0_105] : memref<2x6x96xf32, #tpu.memory_space<vmem>>, vector<1x4x96xf32>
    %110 = vector.shape_cast %109 : vector<1x4x96xf32> to vector<4x96xf32>
    %c0_106 = arith.constant 0 : index
    %c2_107 = arith.constant 2 : index
    %c0_108 = arith.constant 0 : index
    %111 = vector.load %arg31[%c0_106, %c2_107, %c0_108] : memref<2x6x96xf32, #tpu.memory_space<vmem>>, vector<1x4x96xf32>
    %112 = vector.shape_cast %111 : vector<1x4x96xf32> to vector<4x96xf32>
    %113 = tpu.concatenate %108, %110, %112 in 1 : vector<4x96xf32>, vector<4x96xf32>, vector<4x96xf32> -> vector<4x288xf32>
    %c1_109 = arith.constant 1 : index
    %c0_110 = arith.constant 0 : index
    %c0_111 = arith.constant 0 : index
    %114 = vector.load %arg31[%c1_109, %c0_110, %c0_111] : memref<2x6x96xf32, #tpu.memory_space<vmem>>, vector<1x4x96xf32>
    %115 = vector.shape_cast %114 : vector<1x4x96xf32> to vector<4x96xf32>
    %c1_112 = arith.constant 1 : index
    %c1_113 = arith.constant 1 : index
    %c0_114 = arith.constant 0 : index
    %116 = vector.load %arg31[%c1_112, %c1_113, %c0_114] : memref<2x6x96xf32, #tpu.memory_space<vmem>>, vector<1x4x96xf32>
    %117 = vector.shape_cast %116 : vector<1x4x96xf32> to vector<4x96xf32>
    %c1_115 = arith.constant 1 : index
    %c2_116 = arith.constant 2 : index
    %c0_117 = arith.constant 0 : index
    %118 = vector.load %arg31[%c1_115, %c2_116, %c0_117] : memref<2x6x96xf32, #tpu.memory_space<vmem>>, vector<1x4x96xf32>
    %119 = vector.shape_cast %118 : vector<1x4x96xf32> to vector<4x96xf32>
    %120 = tpu.concatenate %115, %117, %119 in 1 : vector<4x96xf32>, vector<4x96xf32>, vector<4x96xf32> -> vector<4x288xf32>
    %121 = tpu.concatenate %113, %120 in 0 : vector<4x288xf32>, vector<4x288xf32> -> vector<8x288xf32>
    %c0_118 = arith.constant 0 : index
    %c0_119 = arith.constant 0 : index
    %122 = vector.load %arg12[%c0_118, %c0_119] : memref<288x32xf32, #tpu.memory_space<vmem>>, vector<288x32xf32>
    %cst_120 = arith.constant dense<0.000000e+00> : vector<8x32xf32>
    %123 = tpu.matmul %121, %122, %cst_120 {dimension_numbers = #tpu.dot_dimension_numbers<[1], [0], [0], [1], [0, 0, 1, 1], [], []>} : vector<8x288xf32>, vector<288x32xf32>, vector<8x32xf32> -> vector<8x32xf32>
    %c0_121 = arith.constant 0 : index
    %c0_122 = arith.constant 0 : index
    %124 = vector.load %arg13[%c0_121, %c0_122] : memref<1x32xf32, #tpu.memory_space<vmem>>, vector<1x32xf32>
    %125 = vector.broadcast %124 : vector<1x32xf32> to vector<8x32xf32>
    %126 = arith.addf %123, %125 : vector<8x32xf32>
    %cst_123 = arith.constant 0.000000e+00 : f32
    %127 = vector.broadcast %cst_123 : f32 to vector<8x32xf32>
    %128 = arith.cmpf oge, %126, %127 : vector<8x32xf32>
    %cst_124 = arith.constant 0.00999999977 : f32
    %129 = vector.broadcast %cst_124 : f32 to vector<8x32xf32>
    %130 = arith.mulf %129, %126 : vector<8x32xf32>
    %131 = arith.select %128, %126, %130 : vector<8x32xi1>, vector<8x32xf32>
    %cst_125 = arith.constant 0.000000e+00 : f32
    %132 = vector.broadcast %cst_125 : f32 to vector<2x6x48xf32>
    %c0_126 = arith.constant 0 : index
    %c0_127 = arith.constant 0 : index
    %c0_128 = arith.constant 0 : index
    %133 = vector.load %arg32[%c0_126, %c0_127, %c0_128] : memref<2x6x48xf32, #tpu.memory_space<vmem>>, vector<2x6x48xf32>
    tpu.vector_store %arg32[%c0_126, %c0_127, %c0_128], %132 {strides = array<i32>} : memref<2x6x48xf32, #tpu.memory_space<vmem>>, vector<2x6x48xf32>,
    %134 = vector.extract_strided_slice %131 {offsets = [0, 0], sizes = [4, 32], strides = [1, 1]} : vector<8x32xf32> to vector<4x32xf32>
    %c0_129 = arith.constant 0 : index
    %c1_130 = arith.constant 1 : index
    %c8 = arith.constant 8 : index
    %135 = vector.load %arg32[%c0_129, %c1_130, %c8] : memref<2x6x48xf32, #tpu.memory_space<vmem>>, vector<1x4x32xf32>
    %136 = vector.shape_cast %135 : vector<1x4x32xf32> to vector<4x32xf32>
    %137 = vector.shape_cast %134 : vector<4x32xf32> to vector<1x4x32xf32>
    tpu.vector_store %arg32[%c0_129, %c1_130, %c8], %137 {strides = array<i32>} : memref<2x6x48xf32, #tpu.memory_space<vmem>>, vector<1x4x32xf32>,
    %138 = vector.extract_strided_slice %131 {offsets = [4, 0], sizes = [4, 32], strides = [1, 1]} : vector<8x32xf32> to vector<4x32xf32>
    %c1_131 = arith.constant 1 : index
    %c1_132 = arith.constant 1 : index
    %c8_133 = arith.constant 8 : index
    %139 = vector.load %arg32[%c1_131, %c1_132, %c8_133] : memref<2x6x48xf32, #tpu.memory_space<vmem>>, vector<1x4x32xf32>
    %140 = vector.shape_cast %139 : vector<1x4x32xf32> to vector<4x32xf32>
    %141 = vector.shape_cast %138 : vector<4x32xf32> to vector<1x4x32xf32>
    tpu.vector_store %arg32[%c1_131, %c1_132, %c8_133], %141 {strides = array<i32>} : memref<2x6x48xf32, #tpu.memory_space<vmem>>, vector<1x4x32xf32>,
    %c0_134 = arith.constant 0 : index
    %c0_135 = arith.constant 0 : index
    %c0_136 = arith.constant 0 : index
    %142 = vector.load %arg32[%c0_134, %c0_135, %c0_136] : memref<2x6x48xf32, #tpu.memory_space<vmem>>, vector<1x4x48xf32>
    %143 = vector.shape_cast %142 : vector<1x4x48xf32> to vector<4x48xf32>
    %c0_137 = arith.constant 0 : index
    %c1_138 = arith.constant 1 : index
    %c0_139 = arith.constant 0 : index
    %144 = vector.load %arg32[%c0_137, %c1_138, %c0_139] : memref<2x6x48xf32, #tpu.memory_space<vmem>>, vector<1x4x48xf32>
    %145 = vector.shape_cast %144 : vector<1x4x48xf32> to vector<4x48xf32>
    %c0_140 = arith.constant 0 : index
    %c2_141 = arith.constant 2 : index
    %c0_142 = arith.constant 0 : index
    %146 = vector.load %arg32[%c0_140, %c2_141, %c0_142] : memref<2x6x48xf32, #tpu.memory_space<vmem>>, vector<1x4x48xf32>
    %147 = vector.shape_cast %146 : vector<1x4x48xf32> to vector<4x48xf32>
    %148 = tpu.concatenate %143, %145, %147 in 1 : vector<4x48xf32>, vector<4x48xf32>, vector<4x48xf32> -> vector<4x144xf32>
    %c1_143 = arith.constant 1 : index
    %c0_144 = arith.constant 0 : index
    %c0_145 = arith.constant 0 : index
    %149 = vector.load %arg32[%c1_143, %c0_144, %c0_145] : memref<2x6x48xf32, #tpu.memory_space<vmem>>, vector<1x4x48xf32>
    %150 = vector.shape_cast %149 : vector<1x4x48xf32> to vector<4x48xf32>
    %c1_146 = arith.constant 1 : index
    %c1_147 = arith.constant 1 : index
    %c0_148 = arith.constant 0 : index
    %151 = vector.load %arg32[%c1_146, %c1_147, %c0_148] : memref<2x6x48xf32, #tpu.memory_space<vmem>>, vector<1x4x48xf32>
    %152 = vector.shape_cast %151 : vector<1x4x48xf32> to vector<4x48xf32>
    %c1_149 = arith.constant 1 : index
    %c2_150 = arith.constant 2 : index
    %c0_151 = arith.constant 0 : index
    %153 = vector.load %arg32[%c1_149, %c2_150, %c0_151] : memref<2x6x48xf32, #tpu.memory_space<vmem>>, vector<1x4x48xf32>
    %154 = vector.shape_cast %153 : vector<1x4x48xf32> to vector<4x48xf32>
    %155 = tpu.concatenate %150, %152, %154 in 1 : vector<4x48xf32>, vector<4x48xf32>, vector<4x48xf32> -> vector<4x144xf32>
    %156 = tpu.concatenate %148, %155 in 0 : vector<4x144xf32>, vector<4x144xf32> -> vector<8x144xf32>
    %c0_152 = arith.constant 0 : index
    %c0_153 = arith.constant 0 : index
    %157 = vector.load %arg14[%c0_152, %c0_153] : memref<144x32xf32, #tpu.memory_space<vmem>>, vector<144x32xf32>
    %cst_154 = arith.constant dense<0.000000e+00> : vector<8x32xf32>
    %158 = tpu.matmul %156, %157, %cst_154 {dimension_numbers = #tpu.dot_dimension_numbers<[1], [0], [0], [1], [0, 0, 1, 1], [], []>} : vector<8x144xf32>, vector<144x32xf32>, vector<8x32xf32> -> vector<8x32xf32>
    %c0_155 = arith.constant 0 : index
    %c0_156 = arith.constant 0 : index
    %159 = vector.load %arg15[%c0_155, %c0_156] : memref<1x32xf32, #tpu.memory_space<vmem>>, vector<1x32xf32>
    %160 = vector.broadcast %159 : vector<1x32xf32> to vector<8x32xf32>
    %161 = arith.addf %158, %160 : vector<8x32xf32>
    %cst_157 = arith.constant 0.000000e+00 : f32
    %162 = vector.broadcast %cst_157 : f32 to vector<8x32xf32>
    %163 = arith.cmpf oge, %161, %162 : vector<8x32xf32>
    %cst_158 = arith.constant 0.00999999977 : f32
    %164 = vector.broadcast %cst_158 : f32 to vector<8x32xf32>
    %165 = arith.mulf %164, %161 : vector<8x32xf32>
    %166 = arith.select %163, %161, %165 : vector<8x32xi1>, vector<8x32xf32>
    %c0_159 = arith.constant 0 : index
    %c0_160 = arith.constant 0 : index
    %167 = vector.load %arg16[%c0_159, %c0_160] : memref<32x32xf32, #tpu.memory_space<vmem>>, vector<32x32xf32>
    %cst_161 = arith.constant dense<0.000000e+00> : vector<8x32xf32>
    %168 = tpu.matmul %166, %167, %cst_161 {dimension_numbers = #tpu.dot_dimension_numbers<[1], [0], [0], [1], [0, 0, 1, 1], [], []>} : vector<8x32xf32>, vector<32x32xf32>, vector<8x32xf32> -> vector<8x32xf32>
    %c0_162 = arith.constant 0 : index
    %c0_163 = arith.constant 0 : index
    %169 = vector.load %arg17[%c0_162, %c0_163] : memref<1x32xf32, #tpu.memory_space<vmem>>, vector<1x32xf32>
    %170 = vector.broadcast %169 : vector<1x32xf32> to vector<8x32xf32>
    %171 = arith.addf %168, %170 : vector<8x32xf32>
    %c0_164 = arith.constant 0 : index
    %c0_165 = arith.constant 0 : index
    %172 = vector.load %arg19[%c0_164, %c0_165] : memref<32x64xf32, #tpu.memory_space<vmem>>, vector<32x64xf32>
    %cst_166 = arith.constant dense<0.000000e+00> : vector<8x64xf32>
    %173 = tpu.matmul %171, %172, %cst_166 {dimension_numbers = #tpu.dot_dimension_numbers<[1], [0], [0], [1], [0, 0, 1, 1], [], []>} : vector<8x32xf32>, vector<32x64xf32>, vector<8x64xf32> -> vector<8x64xf32>
    %c0_167 = arith.constant 0 : index
    %c0_168 = arith.constant 0 : index
    %174 = vector.load %arg18[%c0_167, %c0_168] : memref<8x4xf32, #tpu.memory_space<vmem>>, vector<8x4xf32>
    %175 = vector.extract_strided_slice %173 {offsets = [0, 0], sizes = [4, 64], strides = [1, 1]} : vector<8x64xf32> to vector<4x64xf32>
    %cst_169 = arith.constant dense<0.000000e+00> : vector<8x64xf32>
    %176 = tpu.matmul %174, %175, %cst_169 {dimension_numbers = #tpu.dot_dimension_numbers<[1], [0], [0], [1], [0, 0, 1, 1], [], []>} : vector<8x4xf32>, vector<4x64xf32>, vector<8x64xf32> -> vector<8x64xf32>
    %177 = vector.extract_strided_slice %173 {offsets = [4, 0], sizes = [4, 64], strides = [1, 1]} : vector<8x64xf32> to vector<4x64xf32>
    %cst_170 = arith.constant dense<0.000000e+00> : vector<8x64xf32>
    %178 = tpu.matmul %174, %177, %cst_170 {dimension_numbers = #tpu.dot_dimension_numbers<[1], [0], [0], [1], [0, 0, 1, 1], [], []>} : vector<8x4xf32>, vector<4x64xf32>, vector<8x64xf32> -> vector<8x64xf32>
    %179 = tpu.concatenate %176, %178 in 0 : vector<8x64xf32>, vector<8x64xf32> -> vector<16x64xf32>
    %cst_171 = arith.constant 0.000000e+00 : f32
    %180 = vector.broadcast %cst_171 : f32 to vector<2x10x80xf32>
    %c0_172 = arith.constant 0 : index
    %c0_173 = arith.constant 0 : index
    %c0_174 = arith.constant 0 : index
    %181 = vector.load %arg33[%c0_172, %c0_173, %c0_174] : memref<2x10x80xf32, #tpu.memory_space<vmem>>, vector<2x10x80xf32>
    tpu.vector_store %arg33[%c0_172, %c0_173, %c0_174], %180 {strides = array<i32>} : memref<2x10x80xf32, #tpu.memory_space<vmem>>, vector<2x10x80xf32>,
    %182 = vector.extract_strided_slice %179 {offsets = [0, 0], sizes = [8, 64], strides = [1, 1]} : vector<16x64xf32> to vector<8x64xf32>
    %c0_175 = arith.constant 0 : index
    %c1_176 = arith.constant 1 : index
    %c8_177 = arith.constant 8 : index
    %183 = vector.load %arg33[%c0_175, %c1_176, %c8_177] : memref<2x10x80xf32, #tpu.memory_space<vmem>>, vector<1x8x64xf32>
    %184 = vector.shape_cast %183 : vector<1x8x64xf32> to vector<8x64xf32>
    %185 = vector.shape_cast %182 : vector<8x64xf32> to vector<1x8x64xf32>
    tpu.vector_store %arg33[%c0_175, %c1_176, %c8_177], %185 {strides = array<i32>} : memref<2x10x80xf32, #tpu.memory_space<vmem>>, vector<1x8x64xf32>,
    %186 = vector.extract_strided_slice %179 {offsets = [8, 0], sizes = [8, 64], strides = [1, 1]} : vector<16x64xf32> to vector<8x64xf32>
    %c1_178 = arith.constant 1 : index
    %c1_179 = arith.constant 1 : index
    %c8_180 = arith.constant 8 : index
    %187 = vector.load %arg33[%c1_178, %c1_179, %c8_180] : memref<2x10x80xf32, #tpu.memory_space<vmem>>, vector<1x8x64xf32>
    %188 = vector.shape_cast %187 : vector<1x8x64xf32> to vector<8x64xf32>
    %189 = vector.shape_cast %186 : vector<8x64xf32> to vector<1x8x64xf32>
    tpu.vector_store %arg33[%c1_178, %c1_179, %c8_180], %189 {strides = array<i32>} : memref<2x10x80xf32, #tpu.memory_space<vmem>>, vector<1x8x64xf32>,
    %c0_181 = arith.constant 0 : index
    %c0_182 = arith.constant 0 : index
    %c0_183 = arith.constant 0 : index
    %190 = vector.load %arg33[%c0_181, %c0_182, %c0_183] : memref<2x10x80xf32, #tpu.memory_space<vmem>>, vector<1x8x80xf32>
    %191 = vector.shape_cast %190 : vector<1x8x80xf32> to vector<8x80xf32>
    %c0_184 = arith.constant 0 : index
    %c1_185 = arith.constant 1 : index
    %c0_186 = arith.constant 0 : index
    %192 = vector.load %arg33[%c0_184, %c1_185, %c0_186] : memref<2x10x80xf32, #tpu.memory_space<vmem>>, vector<1x8x80xf32>
    %193 = vector.shape_cast %192 : vector<1x8x80xf32> to vector<8x80xf32>
    %c0_187 = arith.constant 0 : index
    %c2_188 = arith.constant 2 : index
    %c0_189 = arith.constant 0 : index
    %194 = vector.load %arg33[%c0_187, %c2_188, %c0_189] : memref<2x10x80xf32, #tpu.memory_space<vmem>>, vector<1x8x80xf32>
    %195 = vector.shape_cast %194 : vector<1x8x80xf32> to vector<8x80xf32>
    %196 = tpu.concatenate %191, %193, %195 in 1 : vector<8x80xf32>, vector<8x80xf32>, vector<8x80xf32> -> vector<8x240xf32>
    %c1_190 = arith.constant 1 : index
    %c0_191 = arith.constant 0 : index
    %c0_192 = arith.constant 0 : index
    %197 = vector.load %arg33[%c1_190, %c0_191, %c0_192] : memref<2x10x80xf32, #tpu.memory_space<vmem>>, vector<1x8x80xf32>
    %198 = vector.shape_cast %197 : vector<1x8x80xf32> to vector<8x80xf32>
    %c1_193 = arith.constant 1 : index
    %c1_194 = arith.constant 1 : index
    %c0_195 = arith.constant 0 : index
    %199 = vector.load %arg33[%c1_193, %c1_194, %c0_195] : memref<2x10x80xf32, #tpu.memory_space<vmem>>, vector<1x8x80xf32>
    %200 = vector.shape_cast %199 : vector<1x8x80xf32> to vector<8x80xf32>
    %c1_196 = arith.constant 1 : index
    %c2_197 = arith.constant 2 : index
    %c0_198 = arith.constant 0 : index
    %201 = vector.load %arg33[%c1_196, %c2_197, %c0_198] : memref<2x10x80xf32, #tpu.memory_space<vmem>>, vector<1x8x80xf32>
    %202 = vector.shape_cast %201 : vector<1x8x80xf32> to vector<8x80xf32>
    %203 = tpu.concatenate %198, %200, %202 in 1 : vector<8x80xf32>, vector<8x80xf32>, vector<8x80xf32> -> vector<8x240xf32>
    %204 = tpu.concatenate %196, %203 in 0 : vector<8x240xf32>, vector<8x240xf32> -> vector<16x240xf32>
    %c0_199 = arith.constant 0 : index
    %c0_200 = arith.constant 0 : index
    %205 = vector.load %arg20[%c0_199, %c0_200] : memref<240x32xf32, #tpu.memory_space<vmem>>, vector<240x32xf32>
    %cst_201 = arith.constant dense<0.000000e+00> : vector<16x32xf32>
    %206 = tpu.matmul %204, %205, %cst_201 {dimension_numbers = #tpu.dot_dimension_numbers<[1], [0], [0], [1], [0, 0, 1, 1], [], []>} : vector<16x240xf32>, vector<240x32xf32>, vector<16x32xf32> -> vector<16x32xf32>
    %c0_202 = arith.constant 0 : index
    %c0_203 = arith.constant 0 : index
    %207 = vector.load %arg21[%c0_202, %c0_203] : memref<1x32xf32, #tpu.memory_space<vmem>>, vector<1x32xf32>
    %208 = vector.broadcast %207 : vector<1x32xf32> to vector<16x32xf32>
    %209 = arith.addf %206, %208 : vector<16x32xf32>
    %cst_204 = arith.constant 0.000000e+00 : f32
    %210 = vector.broadcast %cst_204 : f32 to vector<16x32xf32>
    %211 = arith.cmpf oge, %209, %210 : vector<16x32xf32>
    %cst_205 = arith.constant 0.00999999977 : f32
    %212 = vector.broadcast %cst_205 : f32 to vector<16x32xf32>
    %213 = arith.mulf %212, %209 : vector<16x32xf32>
    %214 = arith.select %211, %209, %213 : vector<16x32xi1>, vector<16x32xf32>
    %c0_206 = arith.constant 0 : index
    %c0_207 = arith.constant 0 : index
    %215 = vector.load %arg22[%c0_206, %c0_207] : memref<32x32xf32, #tpu.memory_space<vmem>>, vector<32x32xf32>
    %cst_208 = arith.constant dense<0.000000e+00> : vector<16x32xf32>
    %216 = tpu.matmul %214, %215, %cst_208 {dimension_numbers = #tpu.dot_dimension_numbers<[1], [0], [0], [1], [0, 0, 1, 1], [], []>} : vector<16x32xf32>, vector<32x32xf32>, vector<16x32xf32> -> vector<16x32xf32>
    %c0_209 = arith.constant 0 : index
    %c0_210 = arith.constant 0 : index
    %217 = vector.load %arg23[%c0_209, %c0_210] : memref<1x32xf32, #tpu.memory_space<vmem>>, vector<1x32xf32>
    %218 = vector.broadcast %217 : vector<1x32xf32> to vector<16x32xf32>
    %219 = arith.addf %216, %218 : vector<16x32xf32>
    %c0_211 = arith.constant 0 : index
    %c0_212 = arith.constant 0 : index
    %220 = vector.load %arg25[%c0_211, %c0_212] : memref<32x64xf32, #tpu.memory_space<vmem>>, vector<32x64xf32>
    %cst_213 = arith.constant dense<0.000000e+00> : vector<16x64xf32>
    %221 = tpu.matmul %219, %220, %cst_213 {dimension_numbers = #tpu.dot_dimension_numbers<[1], [0], [0], [1], [0, 0, 1, 1], [], []>} : vector<16x32xf32>, vector<32x64xf32>, vector<16x64xf32> -> vector<16x64xf32>
    %c0_214 = arith.constant 0 : index
    %c0_215 = arith.constant 0 : index
    %222 = vector.load %arg24[%c0_214, %c0_215] : memref<16x8xf32, #tpu.memory_space<vmem>>, vector<16x8xf32>
    %223 = vector.extract_strided_slice %221 {offsets = [0, 0], sizes = [8, 64], strides = [1, 1]} : vector<16x64xf32> to vector<8x64xf32>
    %cst_216 = arith.constant dense<0.000000e+00> : vector<16x64xf32>
    %224 = tpu.matmul %222, %223, %cst_216 {dimension_numbers = #tpu.dot_dimension_numbers<[1], [0], [0], [1], [0, 0, 1, 1], [], []>} : vector<16x8xf32>, vector<8x64xf32>, vector<16x64xf32> -> vector<16x64xf32>
    %225 = vector.extract_strided_slice %221 {offsets = [8, 0], sizes = [8, 64], strides = [1, 1]} : vector<16x64xf32> to vector<8x64xf32>
    %cst_217 = arith.constant dense<0.000000e+00> : vector<16x64xf32>
    %226 = tpu.matmul %222, %225, %cst_217 {dimension_numbers = #tpu.dot_dimension_numbers<[1], [0], [0], [1], [0, 0, 1, 1], [], []>} : vector<16x8xf32>, vector<8x64xf32>, vector<16x64xf32> -> vector<16x64xf32>
    %227 = tpu.concatenate %224, %226 in 0 : vector<16x64xf32>, vector<16x64xf32> -> vector<32x64xf32>
    %c0_218 = arith.constant 0 : index
    %c0_219 = arith.constant 0 : index
    %228 = vector.load %arg26[%c0_218, %c0_219] : memref<64x16xf32, #tpu.memory_space<vmem>>, vector<64x16xf32>
    %cst_220 = arith.constant dense<0.000000e+00> : vector<32x16xf32>
    %229 = tpu.matmul %227, %228, %cst_220 {dimension_numbers = #tpu.dot_dimension_numbers<[1], [0], [0], [1], [0, 0, 1, 1], [], []>} : vector<32x64xf32>, vector<64x16xf32>, vector<32x16xf32> -> vector<32x16xf32>
    %c0_221 = arith.constant 0 : index
    %c0_222 = arith.constant 0 : index
    %230 = vector.load %arg27[%c0_221, %c0_222] : memref<1x16xf32, #tpu.memory_space<vmem>>, vector<1x16xf32>
    %231 = vector.broadcast %230 : vector<1x16xf32> to vector<32x16xf32>
    %232 = arith.addf %229, %231 : vector<32x16xf32>
    %cst_223 = arith.constant 0.000000e+00 : f32
    %233 = vector.broadcast %cst_223 : f32 to vector<32x16xf32>
    %234 = arith.subf %233, %232 : vector<32x16xf32>
    %235 = math.exp %234 : vector<32x16xf32>
    %cst_224 = arith.constant 1.000000e+00 : f32
    %236 = vector.broadcast %cst_224 : f32 to vector<32x16xf32>
    %237 = arith.addf %236, %235 : vector<32x16xf32>
    %238 = tpu.reciprocal %237 {approx = true} : vector<32x16xf32> -> vector<32x16xf32>
    %cst_225 = arith.constant 1.000000e+00 : f32
    %239 = vector.broadcast %cst_225 : f32 to vector<32x16xf32>
    %240 = arith.minimumf %238, %239 : vector<32x16xf32>
    %241 = vector.extract_strided_slice %240 {offsets = [0, 0], sizes = [1, 16], strides = [1, 1]} : vector<32x16xf32> to vector<1x16xf32>
    %242 = vector.extract_strided_slice %240 {offsets = [1, 0], sizes = [1, 16], strides = [1, 1]} : vector<32x16xf32> to vector<1x16xf32>
    %243 = vector.extract_strided_slice %240 {offsets = [2, 0], sizes = [1, 16], strides = [1, 1]} : vector<32x16xf32> to vector<1x16xf32>
    %244 = vector.extract_strided_slice %240 {offsets = [3, 0], sizes = [1, 16], strides = [1, 1]} : vector<32x16xf32> to vector<1x16xf32>
    %245 = vector.extract_strided_slice %240 {offsets = [4, 0], sizes = [1, 16], strides = [1, 1]} : vector<32x16xf32> to vector<1x16xf32>
    %246 = vector.extract_strided_slice %240 {offsets = [5, 0], sizes = [1, 16], strides = [1, 1]} : vector<32x16xf32> to vector<1x16xf32>
    %247 = vector.extract_strided_slice %240 {offsets = [6, 0], sizes = [1, 16], strides = [1, 1]} : vector<32x16xf32> to vector<1x16xf32>
    %248 = vector.extract_strided_slice %240 {offsets = [7, 0], sizes = [1, 16], strides = [1, 1]} : vector<32x16xf32> to vector<1x16xf32>
    %249 = vector.extract_strided_slice %240 {offsets = [8, 0], sizes = [1, 16], strides = [1, 1]} : vector<32x16xf32> to vector<1x16xf32>
    %250 = vector.extract_strided_slice %240 {offsets = [9, 0], sizes = [1, 16], strides = [1, 1]} : vector<32x16xf32> to vector<1x16xf32>
    %251 = vector.extract_strided_slice %240 {offsets = [10, 0], sizes = [1, 16], strides = [1, 1]} : vector<32x16xf32> to vector<1x16xf32>
    %252 = vector.extract_strided_slice %240 {offsets = [11, 0], sizes = [1, 16], strides = [1, 1]} : vector<32x16xf32> to vector<1x16xf32>
    %253 = vector.extract_strided_slice %240 {offsets = [12, 0], sizes = [1, 16], strides = [1, 1]} : vector<32x16xf32> to vector<1x16xf32>
    %254 = vector.extract_strided_slice %240 {offsets = [13, 0], sizes = [1, 16], strides = [1, 1]} : vector<32x16xf32> to vector<1x16xf32>
    %255 = vector.extract_strided_slice %240 {offsets = [14, 0], sizes = [1, 16], strides = [1, 1]} : vector<32x16xf32> to vector<1x16xf32>
    %256 = vector.extract_strided_slice %240 {offsets = [15, 0], sizes = [1, 16], strides = [1, 1]} : vector<32x16xf32> to vector<1x16xf32>
    %257 = tpu.concatenate %241, %242, %243, %244, %245, %246, %247, %248, %249, %250, %251, %252, %253, %254, %255, %256 in 1 : vector<1x16xf32>, vector<1x16xf32>, vector<1x16xf32>, vector<1x16xf32>, vector<1x16xf32>, vector<1x16xf32>, vector<1x16xf32>, vector<1x16xf32>, vector<1x16xf32>, vector<1x16xf32>, vector<1x16xf32>, vector<1x16xf32>, vector<1x16xf32>, vector<1x16xf32>, vector<1x16xf32>, vector<1x16xf32> -> vector<1x256xf32>
    %258 = vector.extract_strided_slice %240 {offsets = [16, 0], sizes = [1, 16], strides = [1, 1]} : vector<32x16xf32> to vector<1x16xf32>
    %259 = vector.extract_strided_slice %240 {offsets = [17, 0], sizes = [1, 16], strides = [1, 1]} : vector<32x16xf32> to vector<1x16xf32>
    %260 = vector.extract_strided_slice %240 {offsets = [18, 0], sizes = [1, 16], strides = [1, 1]} : vector<32x16xf32> to vector<1x16xf32>
    %261 = vector.extract_strided_slice %240 {offsets = [19, 0], sizes = [1, 16], strides = [1, 1]} : vector<32x16xf32> to vector<1x16xf32>
    %262 = vector.extract_strided_slice %240 {offsets = [20, 0], sizes = [1, 16], strides = [1, 1]} : vector<32x16xf32> to vector<1x16xf32>
    %263 = vector.extract_strided_slice %240 {offsets = [21, 0], sizes = [1, 16], strides = [1, 1]} : vector<32x16xf32> to vector<1x16xf32>
    %264 = vector.extract_strided_slice %240 {offsets = [22, 0], sizes = [1, 16], strides = [1, 1]} : vector<32x16xf32> to vector<1x16xf32>
    %265 = vector.extract_strided_slice %240 {offsets = [23, 0], sizes = [1, 16], strides = [1, 1]} : vector<32x16xf32> to vector<1x16xf32>
    %266 = vector.extract_strided_slice %240 {offsets = [24, 0], sizes = [1, 16], strides = [1, 1]} : vector<32x16xf32> to vector<1x16xf32>
    %267 = vector.extract_strided_slice %240 {offsets = [25, 0], sizes = [1, 16], strides = [1, 1]} : vector<32x16xf32> to vector<1x16xf32>
    %268 = vector.extract_strided_slice %240 {offsets = [26, 0], sizes = [1, 16], strides = [1, 1]} : vector<32x16xf32> to vector<1x16xf32>
    %269 = vector.extract_strided_slice %240 {offsets = [27, 0], sizes = [1, 16], strides = [1, 1]} : vector<32x16xf32> to vector<1x16xf32>
    %270 = vector.extract_strided_slice %240 {offsets = [28, 0], sizes = [1, 16], strides = [1, 1]} : vector<32x16xf32> to vector<1x16xf32>
    %271 = vector.extract_strided_slice %240 {offsets = [29, 0], sizes = [1, 16], strides = [1, 1]} : vector<32x16xf32> to vector<1x16xf32>
    %272 = vector.extract_strided_slice %240 {offsets = [30, 0], sizes = [1, 16], strides = [1, 1]} : vector<32x16xf32> to vector<1x16xf32>
    %273 = vector.extract_strided_slice %240 {offsets = [31, 0], sizes = [1, 16], strides = [1, 1]} : vector<32x16xf32> to vector<1x16xf32>
    %274 = tpu.concatenate %258, %259, %260, %261, %262, %263, %264, %265, %266, %267, %268, %269, %270, %271, %272, %273 in 1 : vector<1x16xf32>, vector<1x16xf32>, vector<1x16xf32>, vector<1x16xf32>, vector<1x16xf32>, vector<1x16xf32>, vector<1x16xf32>, vector<1x16xf32>, vector<1x16xf32>, vector<1x16xf32>, vector<1x16xf32>, vector<1x16xf32>, vector<1x16xf32>, vector<1x16xf32>, vector<1x16xf32>, vector<1x16xf32> -> vector<1x256xf32>
    %275 = tpu.concatenate %257, %274 in 0 : vector<1x256xf32>, vector<1x256xf32> -> vector<2x256xf32>
    %c0_226 = arith.constant 0 : index
    %c0_227 = arith.constant 0 : index
    %276 = vector.load %arg28[%c0_226, %c0_227] : memref<2x256xf32, #tpu.memory_space<vmem>>, vector<2x256xf32>
    tpu.vector_store %arg28[%c0_226, %c0_227], %275 {strides = array<i32>} : memref<2x256xf32, #tpu.memory_space<vmem>>, vector<2x256xf32>,
    return
  }
  func.func @transform_0(%arg0: i32) -> (i32, i32) {
    %c0_i32 = arith.constant 0 : i32
    %c0_i32_0 = arith.constant 0 : i32
    %c0_i32_1 = arith.constant 0 : i32
    return %c0_i32, %c0_i32_0 : i32, i32
  }
  func.func @transform_1(%arg0: i32) -> (i32, i32) {
    %c0_i32 = arith.constant 0 : i32
    %c0_i32_0 = arith.constant 0 : i32
    %c0_i32_1 = arith.constant 0 : i32
    return %c0_i32, %c0_i32_0 : i32, i32
  }
  func.func @transform_2(%arg0: i32) -> (i32, i32) {
    %c0_i32 = arith.constant 0 : i32
    %c0_i32_0 = arith.constant 0 : i32
    %c0_i32_1 = arith.constant 0 : i32
    return %c0_i32, %c0_i32_0 : i32, i32
  }
  func.func @transform_3(%arg0: i32) -> (i32, i32) {
    %c0_i32 = arith.constant 0 : i32
    %c0_i32_0 = arith.constant 0 : i32
    %c0_i32_1 = arith.constant 0 : i32
    return %c0_i32, %c0_i32_0 : i32, i32
  }
  func.func @transform_4(%arg0: i32) -> (i32, i32) {
    %c0_i32 = arith.constant 0 : i32
    %c0_i32_0 = arith.constant 0 : i32
    %c0_i32_1 = arith.constant 0 : i32
    return %c0_i32, %c0_i32_0 : i32, i32
  }
  func.func @transform_5(%arg0: i32) -> (i32, i32) {
    %c0_i32 = arith.constant 0 : i32
    %c0_i32_0 = arith.constant 0 : i32
    %c0_i32_1 = arith.constant 0 : i32
    return %c0_i32, %c0_i32_0 : i32, i32
  }
  func.func @transform_6(%arg0: i32) -> (i32, i32) {
    %c0_i32 = arith.constant 0 : i32
    %c0_i32_0 = arith.constant 0 : i32
    %c0_i32_1 = arith.constant 0 : i32
    return %c0_i32, %c0_i32_0 : i32, i32
  }
  func.func @transform_7(%arg0: i32) -> (i32, i32) {
    %c0_i32 = arith.constant 0 : i32
    %c0_i32_0 = arith.constant 0 : i32
    %c0_i32_1 = arith.constant 0 : i32
    return %c0_i32, %c0_i32_0 : i32, i32
  }
  func.func @transform_8(%arg0: i32) -> (i32, i32) {
    %c0_i32 = arith.constant 0 : i32
    %c0_i32_0 = arith.constant 0 : i32
    %c0_i32_1 = arith.constant 0 : i32
    return %c0_i32, %c0_i32_0 : i32, i32
  }
  func.func @transform_9(%arg0: i32) -> (i32, i32) {
    %c0_i32 = arith.constant 0 : i32
    %c0_i32_0 = arith.constant 0 : i32
    %c0_i32_1 = arith.constant 0 : i32
    return %c0_i32, %c0_i32_0 : i32, i32
  }
  func.func @transform_10(%arg0: i32) -> (i32, i32) {
    %c0_i32 = arith.constant 0 : i32
    %c0_i32_0 = arith.constant 0 : i32
    %c0_i32_1 = arith.constant 0 : i32
    return %c0_i32, %c0_i32_0 : i32, i32
  }
  func.func @transform_11(%arg0: i32) -> (i32, i32) {
    %c0_i32 = arith.constant 0 : i32
    %c0_i32_0 = arith.constant 0 : i32
    %c0_i32_1 = arith.constant 0 : i32
    return %c0_i32, %c0_i32_0 : i32, i32
  }
  func.func @transform_12(%arg0: i32) -> (i32, i32) {
    %c0_i32 = arith.constant 0 : i32
    %c0_i32_0 = arith.constant 0 : i32
    %c0_i32_1 = arith.constant 0 : i32
    return %c0_i32, %c0_i32_0 : i32, i32
  }
  func.func @transform_13(%arg0: i32) -> (i32, i32) {
    %c0_i32 = arith.constant 0 : i32
    %c0_i32_0 = arith.constant 0 : i32
    %c0_i32_1 = arith.constant 0 : i32
    return %c0_i32, %c0_i32_0 : i32, i32
  }
  func.func @transform_14(%arg0: i32) -> (i32, i32) {
    %c0_i32 = arith.constant 0 : i32
    %c0_i32_0 = arith.constant 0 : i32
    %c0_i32_1 = arith.constant 0 : i32
    return %c0_i32, %c0_i32_0 : i32, i32
  }
  func.func @transform_15(%arg0: i32) -> (i32, i32) {
    %c0_i32 = arith.constant 0 : i32
    %c0_i32_0 = arith.constant 0 : i32
    %c0_i32_1 = arith.constant 0 : i32
    return %c0_i32, %c0_i32_0 : i32, i32
  }
  func.func @transform_16(%arg0: i32) -> (i32, i32) {
    %c0_i32 = arith.constant 0 : i32
    %c0_i32_0 = arith.constant 0 : i32
    %c0_i32_1 = arith.constant 0 : i32
    return %c0_i32, %c0_i32_0 : i32, i32
  }
  func.func @transform_17(%arg0: i32) -> (i32, i32) {
    %c0_i32 = arith.constant 0 : i32
    %c0_i32_0 = arith.constant 0 : i32
    %c0_i32_1 = arith.constant 0 : i32
    return %c0_i32, %c0_i32_0 : i32, i32
  }
  func.func @transform_18(%arg0: i32) -> (i32, i32) {
    %c0_i32 = arith.constant 0 : i32
    %c0_i32_0 = arith.constant 0 : i32
    %c0_i32_1 = arith.constant 0 : i32
    return %c0_i32, %c0_i32_0 : i32, i32
  }
  func.func @transform_19(%arg0: i32) -> (i32, i32) {
    %c0_i32 = arith.constant 0 : i32
    %c0_i32_0 = arith.constant 0 : i32
    %c0_i32_1 = arith.constant 0 : i32
    return %c0_i32, %c0_i32_0 : i32, i32
  }
  func.func @transform_20(%arg0: i32) -> (i32, i32) {
    %c0_i32 = arith.constant 0 : i32
    %c0_i32_0 = arith.constant 0 : i32
    %c0_i32_1 = arith.constant 0 : i32
    return %c0_i32, %c0_i32_0 : i32, i32
  }
  func.func @transform_21(%arg0: i32) -> (i32, i32) {
    %c0_i32 = arith.constant 0 : i32
    %c0_i32_0 = arith.constant 0 : i32
    %c0_i32_1 = arith.constant 0 : i32
    return %c0_i32, %c0_i32_0 : i32, i32
  }
  func.func @transform_22(%arg0: i32) -> (i32, i32) {
    %c0_i32 = arith.constant 0 : i32
    %c0_i32_0 = arith.constant 0 : i32
    %c0_i32_1 = arith.constant 0 : i32
    return %c0_i32, %c0_i32_0 : i32, i32
  }
  func.func @transform_23(%arg0: i32) -> (i32, i32) {
    %c0_i32 = arith.constant 0 : i32
    %c0_i32_0 = arith.constant 0 : i32
    %c0_i32_1 = arith.constant 0 : i32
    return %c0_i32, %c0_i32_0 : i32, i32
  }
  func.func @transform_24(%arg0: i32) -> (i32, i32) {
    %c0_i32 = arith.constant 0 : i32
    %c0_i32_0 = arith.constant 0 : i32
    %c0_i32_1 = arith.constant 0 : i32
    return %c0_i32, %c0_i32_0 : i32, i32
  }
  func.func @transform_25(%arg0: i32) -> (i32, i32) {
    %c0_i32 = arith.constant 0 : i32
    %c0_i32_0 = arith.constant 0 : i32
    %c0_i32_1 = arith.constant 0 : i32
    return %c0_i32, %c0_i32_0 : i32, i32
  }
  func.func @transform_26(%arg0: i32) -> (i32, i32) {
    %c0_i32 = arith.constant 0 : i32
    %c0_i32_0 = arith.constant 0 : i32
    %c0_i32_1 = arith.constant 0 : i32
    return %c0_i32, %c0_i32_0 : i32, i32
  }
  func.func @transform_27(%arg0: i32) -> (i32, i32) {
    %c0_i32 = arith.constant 0 : i32
    %c0_i32_0 = arith.constant 0 : i32
    %c0_i32_1 = arith.constant 0 : i32
    return %c0_i32, %c0_i32_0 : i32, i32
  }
}

</mosaic_0001>

<bundles_post_ra>
// kernel: forward.1
= control target key start
LH: loop header
LB: loop body
LE: loop exit
PB: predicated region body
PF: predicated region fallthrough
CT: control target
= control target key end

     0   :  { %vm95_vm0 = vcmask 64512   ;;  %v2599_v0 = vmov 0.0   ;;  %vm2600_vm1 = vmmov 0   ;;  %vm169_vm2 = vcmask 519168   ;;  %s2601_s29 = smov 16   ;;  %s2604_s30 = smov 96   ;;  %s3607_s1 = inlined_call_operand.vmem [shape: f32[8,64], index: 1, kind: input, shape index: {}]   ;;  %s3608_s0 = inlined_call_operand.vmem [shape: f32[2,8], index: 0, kind: input, shape index: {}]   ;;  %s3609_s2 = inlined_call_operand.vmem [shape: f32[1,64], index: 2, kind: input, shape index: {}]   ;;  %s3610_s3 = inlined_call_operand.vmem [shape: f32[192,32], index: 3, kind: input, shape index: {}]   ;;  %s3611_s4 = inlined_call_operand.vmem [shape: f32[1,32], index: 4, kind: input, shape index: {}]   ;;  %s3612_s5 = inlined_call_operand.vmem [shape: f32[192,32], index: 5, kind: input, shape index: {}]   ;;  %s3613_s7 = inlined_call_operand.vmem [shape: f32[32,32], index: 7, kind: input, shape index: {}]   ;;  %s3614_s6 = inlined_call_operand.vmem [shape: f32[1,32], index: 6, kind: input, shape index: {}]   ;;  %s3615_s10 = inlined_call_operand.vmem [shape: f32[32,64], index: 10, kind: input, shape index: {}]   ;;  %s3616_s8 = inlined_call_operand.vmem [shape: f32[1,32], index: 8, kind: input, shape index: {}]   ;;  %s3617_s9 = inlined_call_operand.vmem [shape: f32[4,2], index: 9, kind: input, shape index: {}]   ;;  %s3618_s11 = inlined_call_operand.vmem [shape: f32[288,32], index: 11, kind: input, shape index: {}]   ;;  %s3619_s12 = inlined_call_operand.vmem [shape: f32[1,32], index: 12, kind: input, shape index: {}]   ;;  %s3620_s13 = inlined_call_operand.vmem [shape: f32[144,32], index: 13, kind: input, shape index: {}]   ;;  %s3621_s15 = inlined_call_operand.vmem [shape: f32[32,32], index: 15, kind: input, shape index: {}]   ;;  %s3622_s14 = inlined_call_operand.vmem [shape: f32[1,32], index: 14, kind: input, shape index: {}]   ;;  %s3623_s18 = inlined_call_operand.vmem [shape: f32[32,64], index: 18, kind: input, shape index: {}]   ;;  %s3624_s16 = inlined_call_operand.vmem [shape: f32[1,32], index: 16, kind: input, shape index: {}]   ;;  %s3625_s17 = inlined_call_operand.vmem [shape: f32[8,4], index: 17, kind: input, shape index: {}]   ;;  %s3626_s19 = inlined_call_operand.vmem [shape: f32[240,32], index: 19, kind: input, shape index: {}]   ;;  %s3627_s21 = inlined_call_operand.vmem [shape: f32[32,32], index: 21, kind: input, shape index: {}]   ;;  %s3628_s24 = inlined_call_operand.vmem [shape: f32[32,64], index: 24, kind: input, shape index: {}]   ;;  %s3629_s20 = inlined_call_operand.vmem [shape: f32[1,32], index: 20, kind: input, shape index: {}]   ;;  %s3630_s22 = inlined_call_operand.vmem [shape: f32[1,32], index: 22, kind: input, shape index: {}]   ;;  %s3631_s23 = inlined_call_operand.vmem [shape: f32[16,8], index: 23, kind: input, shape index: {}]   ;;  %s3632_s25 = inlined_call_operand.vmem [shape: f32[64,16], index: 25, kind: input, shape index: {}]   ;;  %s3633_s26 = inlined_call_operand.vmem [shape: f32[1,16], index: 26, kind: input, shape index: {}]   ;;  %s3634_s27 = inlined_call_operand.vmem [shape: f32[2,256], index: 27, kind: output, shape index: {}]  }
   0x1   :  { %3640 = sst [smem:[#allocation7_spill]] %s3607_s1  ;;  %2429 = vmatprep.subr.mxu0 %v2599_v0  ;;  %2431 = vmatprep.mubr.msk.f32.mxu0 %vm2600_vm1, %v2599_v0  ;;  %170 = vst.msk [vmem:[#allocation2] sm:$0xf] %vm169_vm2, %v2599_v0  ;;  %171 = vst.msk [vmem:[#allocation2 + $0x4] sm:$0xf] %vm169_vm2, %v2599_v0  ;;  %s2602_s1 = smov 112  }
   0x2   :  { %3641 = sst [smem:[#allocation8_spill]] %s3608_s0  ;;  %246 = vmatprep.subr.mxu1 %v2599_v0  ;;  %319 = vst.msk [vmem:[#allocation3] sm:$0xf] %vm169_vm2, %v2599_v0  ;;  %320 = vst.msk [vmem:[#allocation3 + $0x4] sm:$0xf] %vm169_vm2, %v2599_v0  ;;  %vm176_vm3 = vcmask 385152  }
   0x3   :  { %3642 = sst [smem:[#allocation9_spill]] %s3609_s2  ;;  %vm183_vm4 = vcmask 386177   ;;  %vm209_vm5 = vcmask 1041408   ;;  %vm193_vm6 = vcmask 523264   ;;  %vm325_vm8 = vcmask 386176  }
   0x4   :  { %3643 = sst [smem:[#allocation10_spill]] %s3610_s3  ;;  %vm328_vm9 = vcmask 388226   ;;  %vm472_vm11 = vcmask 261120   ;;  %vm624_vm12 = vcmask 15360   ;;  %vm779_vm13 = vcmask 783360  }
   0x5   :  { %3644 = sst [smem:[#allocation11_spill]] %s3611_s4  ;;  %780 = vst.msk [vmem:[#allocation4] sm:$0x3f] %vm779_vm13, %v2599_v0  ;;  %781 = vst.msk [vmem:[#allocation4 + $0x8] sm:$0x3f] %vm779_vm13, %v2599_v0  ;;  %vm777_vm14 = vcmask 1043456  }
   0x6   :  { %3645 = sst [smem:[#allocation12_spill]] %s3612_s5  ;;  %vm786_vm15 = vcmask 650368   ;;  %vm789_vm2 = vcmask 654468   ;;  %vm1328_vm13 = vcmask 31744  }
   0x7   :  { %3646 = sst [smem:[#allocation13_spill]] %s3613_s7  ;;  %s2603_s7 = smov 64  }
   0x8   :  { %3647 = sst [smem:[#allocation14_spill]] %s3614_s6 }
   0x9   :  { %3648 = sst [smem:[#allocation15_spill]] %s3615_s10 }
   0xa   :  { %3649 = sst [smem:[#allocation16_spill]] %s3616_s8 }
   0xb   :  { %3650 = sst [smem:[#allocation17_spill]] %s3617_s9 }
   0xc   :  { %3651 = sst [smem:[#allocation18_spill]] %s3618_s11  ;;  %s2606_s11 = smov 48  }
   0xd   :  { %s3652_s10 = sld [smem:[#allocation7_spill]] }
   0xe   :  { %s3653_s5 = sld [smem:[#allocation8_spill]] }
   0xf   :  { %s3654_s9 = sld [smem:[#allocation9_spill]] }
  0x10   :  { %s3655_s2 = sld [smem:[#allocation10_spill]] }
  0x11   :  { %s3656_s3 = sld [smem:[#allocation11_spill]] }
  0x12   :  { %s3658_s0 = sld [smem:[#allocation13_spill]] }
  0x13   :  { %v87_v1 = vld [vmem:[%s3652_s10] sm:$0xff]  ;;  %s3657_s10 = sld [smem:[#allocation12_spill]] }
  0x14   :  { %v86_v2 = vld [vmem:[%s3653_s5] sm:$0x3]  ;;  %2430 = vmatpush3.msra.mxu0 %v87_v1  ;;  %s3659_s8 = sld [smem:[#allocation14_spill]]  ;;  %s2605_s5 = smov 8  }
  0x15   :  { %2432 = vmatmul.mubr.msk.f32.vlgmr.msra.gmra.mxu0 %vm95_vm0, %v86_v2  ;;  %388 = vmatprep.subr.mxu0 %v2599_v0  ;;  %v2287_v3 = vld [vmem:[%s3654_s9] ss:$0 sm:$0xff] }
  0x16   :  { %v227_v7 = vld [vmem:[%s3655_s2 + $0x78] sm:$0xff]  ;;  %v226_v8 = vld [vmem:[%s3655_s2 + $0x70] sm:$0xff]  ;;  %v225_v9 = vld [vmem:[%s3655_s2 + $0x68] sm:$0xff] }
  0x17   :  { %247 = vmatpush1.msra.mxu1 %v227_v7  ;;  %v224_v10 = vld [vmem:[%s3655_s2 + $0x60] sm:$0xff]  ;;  %v223_v11 = vld [vmem:[%s3655_s2 + $0x58] sm:$0xff]  ;;  %v222_v12 = vld [vmem:[%s3655_s2 + $0x50] sm:$0xff] }
  0x18   :  { %248 = vmatprep.subr.mxu1 %v2599_v0  ;;  %v221_v13 = vld [vmem:[%s3655_s2 + $0x48] sm:$0xff]  ;;  %v220_v14 = vld [vmem:[%s3655_s2 + $0x40] sm:$0xff]  ;;  %v219_v15 = vld [vmem:[%s3655_s2 + $0x38] sm:$0xff] }
  0x19   :  { %249 = vmatpush1.msra.mxu1 %v226_v8  ;;  %v218_v16 = vld [vmem:[%s3655_s2 + $0x30] sm:$0xff]  ;;  %v217_v17 = vld [vmem:[%s3655_s2 + $0x28] sm:$0xff]  ;;  %v216_v18 = vld [vmem:[%s3655_s2 + $0x20] sm:$0xff] }
  0x1a   :  { %250 = vmatprep.subr.mxu1 %v2599_v0  ;;  %v215_v19 = vld [vmem:[%s3655_s2 + $0x18] sm:$0xff]  ;;  %v214_v20 = vld [vmem:[%s3655_s2 + $0x10] sm:$0xff]  ;;  %v213_v21 = vld [vmem:[%s3655_s2 + $0x8] sm:$0xff] }
  0x1b   :  { %251 = vmatpush1.msra.mxu1 %v225_v9  ;;  %v212_v22 = vld [vmem:[%s3655_s2] sm:$0xff]  ;;  %v235_v23 = vld [vmem:[%s3655_s2 + $0xb8] sm:$0xff]  ;;  %v234_v24 = vld [vmem:[%s3655_s2 + $0xb0] sm:$0xff] }
  0x1c   :  { %252 = vmatprep.subr.mxu1 %v2599_v0  ;;  %v233_v25 = vld [vmem:[%s3655_s2 + $0xa8] sm:$0xff]  ;;  %v232_v26 = vld [vmem:[%s3655_s2 + $0xa0] sm:$0xff]  ;;  %v231_v27 = vld [vmem:[%s3655_s2 + $0x98] sm:$0xff] }
  0x1d   :  { %253 = vmatpush1.msra.mxu1 %v224_v10  ;;  %v230_v29 = vld [vmem:[%s3655_s2 + $0x90] sm:$0xff]  ;;  %v229_v30 = vld [vmem:[%s3655_s2 + $0x88] sm:$0xff]  ;;  %v228_v32 = vld [vmem:[%s3655_s2 + $0x80] sm:$0xff]  ;;  %s3663_s2 = sld [smem:[#allocation18_spill]] }
  0x1e   :  { %254 = vmatprep.subr.mxu1 %v2599_v0  ;;  %v2289_v47 = vld [vmem:[%s3656_s3] ss:$0 sm:$0xff]  ;;  %v369_v53 = vld [vmem:[%s3657_s10 + $0x78] sm:$0xff]  ;;  %v368_v54 = vld [vmem:[%s3657_s10 + $0x70] sm:$0xff] }
  0x1f   :  { %255 = vmatpush1.msra.mxu1 %v223_v11  ;;  %389 = vmatpush1.msra.mxu0 %v369_v53  ;;  %v367_v55 = vld [vmem:[%s3657_s10 + $0x68] sm:$0xff]  ;;  %v366_v56 = vld [vmem:[%s3657_s10 + $0x60] sm:$0xff]  ;;  %v365_v57 = vld [vmem:[%s3657_s10 + $0x58] sm:$0xff] }
  0x20   :  { %256 = vmatprep.subr.mxu1 %v2599_v0  ;;  %390 = vmatprep.subr.mxu0 %v2599_v0  ;;  %v364_v58 = vld [vmem:[%s3657_s10 + $0x50] sm:$0xff]  ;;  %v363_v59 = vld [vmem:[%s3657_s10 + $0x48] sm:$0xff]  ;;  %v362_v60 = vld [vmem:[%s3657_s10 + $0x40] sm:$0xff] }
  0x21   :  { %257 = vmatpush1.msra.mxu1 %v222_v12  ;;  %391 = vmatpush1.msra.mxu0 %v368_v54  ;;  %v361_v61 = vld [vmem:[%s3657_s10 + $0x38] sm:$0xff]  ;;  %v360_v62 = vld [vmem:[%s3657_s10 + $0x30] sm:$0xff]  ;;  %v359_v63 = vld [vmem:[%s3657_s10 + $0x28] sm:$0xff] }
  0x22   :  { %258 = vmatprep.subr.mxu1 %v2599_v0  ;;  %392 = vmatprep.subr.mxu0 %v2599_v0  ;;  %v358_v1 = vld [vmem:[%s3657_s10 + $0x20] sm:$0xff]  ;;  %v357_v2 = vld [vmem:[%s3657_s10 + $0x18] sm:$0xff]  ;;  %v376_v7 = vld [vmem:[%s3657_s10 + $0xb0] sm:$0xff] }
  0x23   :  { %259 = vmatpush1.msra.mxu1 %v221_v13  ;;  %393 = vmatpush1.msra.mxu0 %v367_v55  ;;  %v375_v8 = vld [vmem:[%s3657_s10 + $0xa8] sm:$0xff]  ;;  %v374_v9 = vld [vmem:[%s3657_s10 + $0xa0] sm:$0xff]  ;;  %v373_v10 = vld [vmem:[%s3657_s10 + $0x98] sm:$0xff] }
  0x24   :  { %260 = vmatprep.subr.mxu1 %v2599_v0  ;;  %394 = vmatprep.subr.mxu0 %v2599_v0  ;;  %v372_v11 = vld [vmem:[%s3657_s10 + $0x90] sm:$0xff]  ;;  %v371_v12 = vld [vmem:[%s3657_s10 + $0x88] sm:$0xff]  ;;  %v370_v13 = vld [vmem:[%s3657_s10 + $0x80] sm:$0xff] }
  0x25   :  { %261 = vmatpush1.msra.mxu1 %v220_v14  ;;  %395 = vmatpush1.msra.mxu0 %v366_v56 }
  0x26   :  { %262 = vmatprep.subr.mxu1 %v2599_v0  ;;  %396 = vmatprep.subr.mxu0 %v2599_v0 }
  0x27   :  { %263 = vmatpush1.msra.mxu1 %v219_v15  ;;  %397 = vmatpush1.msra.mxu0 %v365_v57  ;;  %v464_v15 = vld [vmem:[%s3658_s0 + $0x18] sm:$0xff] }
  0x28   :  { %264 = vmatprep.subr.mxu1 %v2599_v0  ;;  %398 = vmatprep.subr.mxu0 %v2599_v0  ;;  %v860_v57 = vld [vmem:[%s3663_s2 + $0xf8] sm:$0xff] }
  0x29   :  { %265 = vmatpush1.msra.mxu1 %v218_v16  ;;  %399 = vmatpush1.msra.mxu0 %v364_v58  ;;  %v844_v58 = vld [vmem:[%s3663_s2 + $0x78] sm:$0xff] }
  0x2a   :  { %266 = vmatprep.subr.mxu1 %v2599_v0  ;;  %400 = vmatprep.subr.mxu0 %v2599_v0 }
  0x2b   :  { %267 = vmatpush1.msra.mxu1 %v217_v17  ;;  %401 = vmatpush1.msra.mxu0 %v363_v59  ;;  %v859_v59 = vld [vmem:[%s3663_s2 + $0xf0] sm:$0xff] }
  0x2c   :  { %268 = vmatprep.subr.mxu1 %v2599_v0  ;;  %402 = vmatprep.subr.mxu0 %v2599_v0 }
  0x2d   :  { %269 = vmatpush1.msra.mxu1 %v216_v18  ;;  %403 = vmatpush1.msra.mxu0 %v362_v60  ;;  %v843_v60 = vld [vmem:[%s3663_s2 + $0x70] sm:$0xff] }
  0x2e   :  { %270 = vmatprep.subr.mxu1 %v2599_v0  ;;  %404 = vmatprep.subr.mxu0 %v2599_v0 }
  0x2f   :  { %271 = vmatpush1.msra.mxu1 %v215_v19  ;;  %405 = vmatpush1.msra.mxu0 %v361_v61  ;;  %v858_v61 = vld [vmem:[%s3663_s2 + $0xe8] sm:$0xff] }
  0x30   :  { %272 = vmatprep.subr.mxu1 %v2599_v0  ;;  %406 = vmatprep.subr.mxu0 %v2599_v0 }
  0x31   :  { %273 = vmatpush1.msra.mxu1 %v214_v20  ;;  %407 = vmatpush1.msra.mxu0 %v360_v62  ;;  %v842_v62 = vld [vmem:[%s3663_s2 + $0x68] sm:$0xff] }
  0x32   :  { %274 = vmatprep.subr.mxu1 %v2599_v0  ;;  %408 = vmatprep.subr.mxu0 %v2599_v0 }
  0x33   :  { %275 = vmatpush1.msra.mxu1 %v213_v21  ;;  %409 = vmatpush1.msra.mxu0 %v359_v63  ;;  %v857_v63 = vld [vmem:[%s3663_s2 + $0xe0] sm:$0xff] }
  0x34   :  { %276 = vmatprep.subr.mxu1 %v2599_v0  ;;  %410 = vmatprep.subr.mxu0 %v2599_v0 }
  0x35   :  { %277 = vmatpush1.msra.mxu1 %v212_v22  ;;  %411 = vmatpush1.msra.mxu0 %v358_v1  ;;  %v841_v1 = vld [vmem:[%s3663_s2 + $0x60] sm:$0xff] }
  0x36   :  { %294 = vmatprep.subr.mxu1 %v2599_v0  ;;  %412 = vmatprep.subr.mxu0 %v2599_v0 }
  0x37   :  { %295 = vmatpush2.msra.mxu1 %v235_v23  ;;  %413 = vmatpush1.msra.mxu0 %v357_v2  ;;  %v856_v2 = vld [vmem:[%s3663_s2 + $0xd8] sm:$0xff] }
  0x38   :  { %296 = vmatprep.subr.mxu1 %v2599_v0  ;;  %414 = vmatprep.subr.mxu0 %v2599_v0 }
  0x39   :  { %297 = vmatpush2.msra.mxu1 %v234_v24 }
  0x3a   :  { %298 = vmatprep.subr.mxu1 %v2599_v0 }
  0x3b   :  { %299 = vmatpush2.msra.mxu1 %v233_v25 }
  0x3c   :  { %300 = vmatprep.subr.mxu1 %v2599_v0 }
  0x3d   :  { %301 = vmatpush2.msra.mxu1 %v232_v26 }
  0x3e   :  { %302 = vmatprep.subr.mxu1 %v2599_v0 }
  0x3f   :  { %303 = vmatpush2.msra.mxu1 %v231_v27 }
  0x40   :  { %304 = vmatprep.subr.mxu1 %v2599_v0 }
  0x41   :  { %305 = vmatpush2.msra.mxu1 %v230_v29 }
  0x42   :  { %306 = vmatprep.subr.mxu1 %v2599_v0 }
  0x43   :  { %307 = vmatpush2.msra.mxu1 %v229_v30  ;;  %v463_v30 = vld [vmem:[%s3658_s0 + $0x10] sm:$0xff] }
  0x44   :  { %308 = vmatprep.subr.mxu1 %v2599_v0 }
  0x45   :  { %309 = vmatpush2.msra.mxu1 %v228_v32  ;;  %v461_v32 = vld [vmem:[%s3658_s0] sm:$0xff] }
  0x46   :  { %2434 = vmatprep.subr.mxu1 %v2599_v0 }
  0xd5   :  { %v165_v4 = vpop.f32.mrf.mxu0 }
  0xd6   :  { %v166_v5 = vadd.f32 %v2287_v3, %v165_v4  ;;  %v356_v3 = vld [vmem:[%s3657_s10 + $0x10] sm:$0xff]  ;;  %v355_v4 = vld [vmem:[%s3657_s10 + $0x8] sm:$0xff] }
  0xd7   :  { %v2433_v6 = vpop.f32.mrf.mxu0  ;;  %415 = vmatpush1.msra.mxu0 %v356_v3  ;;  %v840_v3 = vld [vmem:[%s3663_s2 + $0x58] sm:$0xff] }
  0xd8   :  { %173 = vrot.lane.b32.xlu0 %v166_v5, %s2601_s29  ;;  %416 = vmatprep.subr.mxu0 %v2599_v0  ;;  %v377_v6 = vld [vmem:[%s3657_s10 + $0xb8] sm:$0xff] }
  0xd9   :  { %417 = vmatpush1.msra.mxu0 %v355_v4  ;;  %v855_v4 = vld [vmem:[%s3663_s2 + $0xd0] sm:$0xff] }
  0xda   :  { %418 = vmatprep.subr.mxu0 %v2599_v0 }
  0xdc   :  { %178 = vrot.lane.b32.xlu0 %v166_v5, %s2602_s1  ;;  %v354_v5 = vld [vmem:[%s3657_s10] sm:$0xff]  ;;  %s3660_s10 = sld [smem:[#allocation15_spill]] }
  0xdd   :  { %419 = vmatpush1.msra.mxu0 %v354_v5  ;;  %v839_v5 = vld [vmem:[%s3663_s2 + $0x50] sm:$0xff] }
  0xde   :  { %436 = vmatprep.subr.mxu0 %v2599_v0 }
  0xdf   :  { %437 = vmatpush2.msra.mxu0 %v377_v6  ;;  %v854_v6 = vld [vmem:[%s3663_s2 + $0xc8] sm:$0xff] }
  0xe0   :  { %438 = vmatprep.subr.mxu0 %v2599_v0 }
  0xe1   :  { %439 = vmatpush2.msra.mxu0 %v376_v7  ;;  %v838_v7 = vld [vmem:[%s3663_s2 + $0x48] sm:$0xff] }
  0xe2   :  { %440 = vmatprep.subr.mxu0 %v2599_v0 }
  0xe3   :  { %441 = vmatpush2.msra.mxu0 %v375_v8  ;;  %v853_v8 = vld [vmem:[%s3663_s2 + $0xc0] sm:$0xff] }
  0xe4   :  { %442 = vmatprep.subr.mxu0 %v2599_v0 }
  0xe5   :  { %443 = vmatpush2.msra.mxu0 %v374_v9  ;;  %v837_v9 = vld [vmem:[%s3663_s2 + $0x40] sm:$0xff] }
  0xe6   :  { %444 = vmatprep.subr.mxu0 %v2599_v0 }
  0xe7   :  { %445 = vmatpush2.msra.mxu0 %v373_v10  ;;  %v852_v10 = vld [vmem:[%s3663_s2 + $0xb8] sm:$0xff] }
  0xe8   :  { %446 = vmatprep.subr.mxu0 %v2599_v0 }
  0xe9   :  { %447 = vmatpush2.msra.mxu0 %v372_v11  ;;  %v836_v11 = vld [vmem:[%s3663_s2 + $0x38] sm:$0xff] }
  0xea   :  { %448 = vmatprep.subr.mxu0 %v2599_v0 }
  0xeb   :  { %449 = vmatpush2.msra.mxu0 %v371_v12  ;;  %v851_v12 = vld [vmem:[%s3663_s2 + $0xb0] sm:$0xff] }
  0xec   :  { %450 = vmatprep.subr.mxu0 %v2599_v0 }
  0xed   :  { %451 = vmatpush2.msra.mxu0 %v370_v13  ;;  %v835_v13 = vld [vmem:[%s3663_s2 + $0x30] sm:$0xff] }
  0xee   :  { %2461 = vmatprep.subr.mxu0 %v2599_v0 }
 0x14a   :  { %v174_v28 = vpop.permute.xlu0 %173 }
 0x14b   :  { %177 = vst.msk [vmem:[#allocation2 + $0x1] sm:$0x1] %vm176_vm3, %v174_v28 }
 0x14c   :  { %184 = vst.msk [vmem:[#allocation2 + $0x4] sm:$0x2] %vm183_vm4, %v174_v28 }
 0x14e   :  { %v179_v31 = vpop.permute.xlu0 %178 }
 0x14f   :  { %181 = vst.msk [vmem:[#allocation2 + $0x2] sm:$0x1] %vm176_vm3, %v179_v31  ;;  %vm802_vm3 = vcmask 785408  }
 0x150   :  { %185 = vst.msk [vmem:[#allocation2 + $0x5] sm:$0x2] %vm183_vm4, %v179_v31  ;;  %v462_v31 = vld [vmem:[%s3658_s0 + $0x8] sm:$0xff]  ;;  %s3662_s0 = sld [smem:[#allocation17_spill]]  ;;  %vm1018_vm4 = vcmask 390144  }
 0x151   :  { %1019 = vst.msk [vmem:[#allocation5] sm:$0x3f] %vm1018_vm4, %v2599_v0  ;;  %1020 = vst.msk [vmem:[#allocation5 + $0x8] sm:$0x3f] %vm1018_vm4, %v2599_v0 }
 0x152   :  { %v186_v43 = vld [vmem:[#allocation2] sm:$0x3] }
 0x153   :  { %v195_v39 = vld [vmem:[#allocation2 + $0x4] sm:$0x3] }
 0x156   :  { %v188_v36 = vld [vmem:[#allocation2 + $0x2] sm:$0x3] }
 0x157   :  { %v196_v33 = vld [vmem:[#allocation2 + $0x5] sm:$0x3]  ;;  %v187_v38 = vld [vmem:[#allocation2 + $0x1] sm:$0x3] }
 0x158   :  { %v197_v34 = vld [vmem:[#allocation2 + $0x6] sm:$0x3]  ;;  %199 = vrot.lane.b32.xlu1 %v196_v33, %s2603_s7  ;;  %v2291_v33 = vld [vmem:[%s3659_s8] ss:$0 sm:$0xff]  ;;  %s3661_s8 = sld [smem:[#allocation16_spill]] }
 0x159   :  { %v206_v35 = vrot.slane %v197_v34, 6 }
 0x15b   :  { %v211_v37 = vsel %vm209_vm5, %v188_v36, %v206_v35 }
 0x15c   :  { %2290 = vmatprep.mubr.msk.f32.mxu1 %vm193_vm6, %v211_v37  ;;  %190 = vrot.lane.b32.xlu1 %v187_v38, %s2603_s7  ;;  %v549_v38 = vld [vmem:[%s3660_s10 + $0x18] sm:$0xff] }
 0x1ca   :  { %v200_v40 = vpop.permute.xlu1 %199 }
 0x1cb   :  { %v202_v41 = vsel %vm193_vm6, %v195_v39, %v200_v40  ;;  %v548_v40 = vld [vmem:[%s3660_s10 + $0x10] sm:$0xff] }
 0x1cc   :  { %v205_v42 = vrot.slane %v202_v41, 6  ;;  %v547_v41 = vld [vmem:[%s3660_s10 + $0x8] sm:$0xff] }
 0x1ce   :  { %v191_v44 = vpop.permute.xlu1 %190 }
 0x1cf   :  { %v194_v45 = vsel %vm193_vm6, %v186_v43, %v191_v44  ;;  %v2293_v43 = vld [vmem:[%s3661_s8] ss:$0 sm:$0xff] }
 0x1d0   :  { %v210_v46 = vsel %vm209_vm5, %v194_v45, %v205_v42  ;;  %v546_v42 = vld [vmem:[%s3660_s10] sm:$0xff] }
 0x1d1   :  { %311 = vmatmul.mubr.f32.vlgmr.msra.gmra.mxu1 %v210_v46 }
 0x1d2   :  { %2442 = vmatprep.mubr.msk.f32.mxu1 %vm2600_vm1, %v2599_v0  ;;  %2435 = vmatpush3.msra.mxu1 %v464_v15  ;;  %v834_v15 = vld [vmem:[%s3663_s2 + $0x28] sm:$0xff] }
 0x1d3   :  { %2436 = vmatprep.subr.mxu1 %v2599_v0 }
 0x1d4   :  { %2437 = vmatpush3.msra.mxu1 %v463_v30  ;;  %v829_v30 = vld [vmem:[%s3663_s2] sm:$0xff] }
 0x1d5   :  { %2438 = vmatprep.subr.mxu1 %v2599_v0 }
 0x1d6   :  { %2439 = vmatpush3.msra.mxu1 %v462_v31 }
 0x1d7   :  { %2440 = vmatprep.subr.mxu1 %v2599_v0 }
 0x1d8   :  { %2441 = vmatpush3.msra.mxu1 %v461_v32 }
 0x1d9   :  { %2445 = vmatprep.subr.mxu1 %v2599_v0 }
 0x291   :  { %v312_v48 = vpop.f32.mrf.mxu1 }
 0x292   :  { %v313_v49 = vadd.f32 %v2289_v47, %v312_v48  ;;  %v623_v47 = vld [vmem:[%s3662_s0] sm:$0xf] }
 0x293   :  { %v314_v50 = vpop.f32.mrf.mxu1 }
 0x294   :  { %v317_v51 = vmul.f32 0.01, %v313_v49  ;;  %vm316_vm7 = vcmp.ge.f32.partialorder %v313_v49, 0.0 }
 0x296   :  { %v318_v52 = vsel %vm316_vm7, %v313_v49, %v317_v51  ;;  %vm1025_vm7 = vcmask 322624  }
 0x297   :  { %322 = vrot.lane.b32.xlu0 %v318_v52, %s2601_s29 }
 0x309   :  { %v323_v14 = vpop.permute.xlu0 %322 }
 0x30a   :  { %326 = vst.msk [vmem:[#allocation3 + $0x1] sm:$0x3] %vm325_vm8, %v323_v14  ;;  %vm1028_vm8 = vcmask 326724  }
 0x30b   :  { %329 = vst.msk [vmem:[#allocation3 + $0x3] sm:$0xc] %vm328_vm9, %v323_v14  ;;  %v850_v14 = vld [vmem:[%s3663_s2 + $0xa8] sm:$0xff]  ;;  %vm1041_vm9 = vcmask 392192  }
 0x311   :  { %v331_v17 = vld [vmem:[#allocation3 + $0x1] sm:$0x3] }
 0x312   :  { %v339_v16 = vld [vmem:[#allocation3 + $0x5] sm:$0x3]  ;;  %334 = vrot.lane.b32.xlu0 %v331_v17, %s2603_s7  ;;  %v332_v20 = vld [vmem:[#allocation3 + $0x2] sm:$0x3]  ;;  %v330_v27 = vld [vmem:[#allocation3] sm:$0x3] }
 0x313   :  { %342 = vrot.lane.b32.xlu1 %v339_v16, %s2603_s7  ;;  %v340_v18 = vld [vmem:[#allocation3 + $0x6] sm:$0x3]  ;;  %v338_v23 = vld [vmem:[#allocation3 + $0x4] sm:$0x3]  ;;  %v849_v16 = vld [vmem:[%s3663_s2 + $0xa0] sm:$0xff] }
 0x314   :  { %v349_v19 = vrot.slane %v340_v18, 6  ;;  %v833_v17 = vld [vmem:[%s3663_s2 + $0x20] sm:$0xff]  ;;  %v864_v18 = vld [vmem:[%s3663_s2 + $0x118] sm:$0xff] }
 0x316   :  { %v353_v21 = vsel %vm209_vm5, %v332_v20, %v349_v19  ;;  %v848_v19 = vld [vmem:[%s3663_s2 + $0x98] sm:$0xff] }
 0x317   :  { %2292 = vmatprep.mubr.msk.f32.mxu0 %vm193_vm6, %v353_v21  ;;  %v832_v20 = vld [vmem:[%s3663_s2 + $0x18] sm:$0xff]  ;;  %v863_v21 = vld [vmem:[%s3663_s2 + $0x110] sm:$0xff] }
 0x384   :  { %v335_v24 = vpop.permute.xlu0 %334 }
 0x385   :  { %v343_v22 = vpop.permute.xlu1 %342  ;;  %v337_v28 = vsel %vm193_vm6, %v330_v27, %v335_v24  ;;  %v831_v24 = vld [vmem:[%s3663_s2 + $0x10] sm:$0xff]  ;;  %v830_v27 = vld [vmem:[%s3663_s2 + $0x8] sm:$0xff] }
 0x386   :  { %v345_v25 = vsel %vm193_vm6, %v338_v23, %v343_v22  ;;  %v847_v22 = vld [vmem:[%s3663_s2 + $0x90] sm:$0xff] }
 0x387   :  { %v348_v26 = vrot.slane %v345_v25, 6  ;;  %v862_v25 = vld [vmem:[%s3663_s2 + $0x108] sm:$0xff] }
 0x389   :  { %v352_v29 = vsel %vm209_vm5, %v337_v28, %v348_v26  ;;  %v846_v26 = vld [vmem:[%s3663_s2 + $0x88] sm:$0xff]  ;;  %v861_v28 = vld [vmem:[%s3663_s2 + $0x100] sm:$0xff] }
 0x38a   :  { %453 = vmatmul.mubr.f32.vlgmr.msra.gmra.mxu0 %v352_v29  ;;  %v845_v29 = vld [vmem:[%s3663_s2 + $0x80] sm:$0xff] }
 0x38b   :  { %2463 = vmatprep.mubr.msk.f32.mxu0 %vm2600_vm1, %v2599_v0 }
 0x44a   :  { %v454_v34 = vpop.f32.mrf.mxu0 }
 0x44b   :  { %v455_v35 = vadd.f32 %v2291_v33, %v454_v34 }
 0x44c   :  { %v456_v36 = vpop.f32.mrf.mxu0 }
 0x44d   :  { %vm458_vm10 = vcmp.ge.f32.partialorder %v455_v35, 0.0  ;;  %v459_v37 = vmul.f32 0.01, %v455_v35 }
 0x44f   :  { %v460_v39 = vsel %vm458_vm10, %v455_v35, %v459_v37  ;;  %vm1089_vm10 = vcmask 130048  }
 0x450   :  { %2443 = vmatmul.mubr.msk.f32.vlgmr.msra.gmra.mxu1 %vm472_vm11, %v460_v39 }
 0x451   :  { %2446 = vmatpush3.msra.mxu1 %v549_v38  ;;  %2453 = vmatprep.mubr.msk.f32.mxu1 %vm2600_vm1, %v2599_v0 }
 0x452   :  { %2447 = vmatprep.subr.mxu1 %v2599_v0 }
 0x453   :  { %2448 = vmatpush3.msra.mxu1 %v548_v40 }
 0x454   :  { %2449 = vmatprep.subr.mxu1 %v2599_v0 }
 0x455   :  { %2450 = vmatpush3.msra.mxu1 %v547_v41 }
 0x456   :  { %2451 = vmatprep.subr.mxu1 %v2599_v0 }
 0x457   :  { %2452 = vmatpush3.msra.mxu1 %v546_v42 }
 0x458   :  { %2456 = vmatprep.subr.mxu1 %v2599_v0 }
 0x510   :  { %v542_v44 = vpop.f32.mrf.mxu1 }
 0x511   :  { %v543_v45 = vadd.f32 %v2293_v43, %v542_v44 }
 0x512   :  { %v2444_v46 = vpop.f32.mrf.mxu1 }
 0x513   :  { %2454 = vmatmul.mubr.msk.f32.vlgmr.msra.gmra.mxu1 %vm472_vm11, %v543_v45 }
 0x514   :  { %2458 = vmatprep.mubr.msk.f32.mxu1 %vm2600_vm1, %v2599_v0 }
 0x5d3   :  { %v619_v48 = vpop.f32.mrf.mxu1 }
 0x5d4   :  { %v701_v49 = vrot.slane %v619_v48, 2  ;;  %2457 = vmatpush3.msk.msra.mxu1 %vm209_vm5, %v619_v48 }
 0x5d5   :  { %v2455_v50 = vpop.f32.mrf.mxu1  ;;  %2459 = vmatmul.mubr.msk.f32.vlgmr.msra.gmra.mxu1 %vm624_vm12, %v623_v47  ;;  %2345 = vmatprep.subr.mxu1 %v860_v57 }
 0x5d6   :  { %2462 = vmatpush3.msk.msra.mxu0 %vm209_vm5, %v701_v49  ;;  %2346 = vmatpush3.msra.mxu1 %v844_v58 }
 0x5d7   :  { %2464 = vmatmul.mubr.msk.f32.vlgmr.msra.gmra.mxu0 %vm624_vm12, %v623_v47  ;;  %2466 = vmatprep.subr.mxu0 %v2599_v0 }
 0x5d8   :  { %2474 = vmatprep.mubr.msk.f32.mxu0 %vm2600_vm1, %v2599_v0  ;;  %2347 = vmatprep.subr.mxu1 %v859_v59 }
 0x5d9   :  { %2348 = vmatpush3.msra.mxu1 %v843_v60  ;;  %2467 = vmatpush3.msra.mxu0 %v864_v18  ;;  %v1080_v18 = vld [vmem:[%s3620_s13 + $0x80] sm:$0xff] }
 0x5da   :  { %2349 = vmatprep.subr.mxu1 %v858_v61  ;;  %2468 = vmatprep.subr.mxu0 %v2599_v0 }
 0x5db   :  { %2350 = vmatpush3.msra.mxu1 %v842_v62  ;;  %2469 = vmatpush3.msra.mxu0 %v863_v21 }
 0x5dc   :  { %2351 = vmatprep.subr.mxu1 %v857_v63  ;;  %2470 = vmatprep.subr.mxu0 %v2599_v0  ;;  %v1079_v63 = vld [vmem:[%s3620_s13 + $0x78] sm:$0xff] }
 0x5dd   :  { %2352 = vmatpush3.msra.mxu1 %v841_v1  ;;  %2471 = vmatpush3.msra.mxu0 %v862_v25  ;;  %v1078_v1 = vld [vmem:[%s3620_s13 + $0x70] sm:$0xff] }
 0x5de   :  { %2353 = vmatprep.subr.mxu1 %v856_v2  ;;  %2472 = vmatprep.subr.mxu0 %v2599_v0  ;;  %v1077_v2 = vld [vmem:[%s3620_s13 + $0x68] sm:$0xff] }
 0x5df   :  { %2354 = vmatpush3.msra.mxu1 %v840_v3  ;;  %2473 = vmatpush3.msra.mxu0 %v861_v28  ;;  %v1076_v3 = vld [vmem:[%s3620_s13 + $0x60] sm:$0xff] }
 0x5e0   :  { %2355 = vmatprep.subr.mxu1 %v855_v4  ;;  %1093 = vmatprep.subr.mxu0 %v2599_v0  ;;  %v1075_v4 = vld [vmem:[%s3620_s13 + $0x58] sm:$0xff] }
 0x5e1   :  { %2356 = vmatpush3.msra.mxu1 %v839_v5  ;;  %v1074_v5 = vld [vmem:[%s3620_s13 + $0x50] sm:$0xff] }
 0x5e2   :  { %2357 = vmatprep.subr.mxu1 %v854_v6  ;;  %v1073_v6 = vld [vmem:[%s3620_s13 + $0x48] sm:$0xff] }
 0x5e3   :  { %2358 = vmatpush3.msra.mxu1 %v838_v7  ;;  %v1072_v7 = vld [vmem:[%s3620_s13 + $0x40] sm:$0xff] }
 0x5e4   :  { %2359 = vmatprep.subr.mxu1 %v853_v8  ;;  %v1071_v8 = vld [vmem:[%s3620_s13 + $0x38] sm:$0xff] }
 0x5e5   :  { %2360 = vmatpush3.msra.mxu1 %v837_v9  ;;  %v1070_v9 = vld [vmem:[%s3620_s13 + $0x30] sm:$0xff] }
 0x5e6   :  { %2361 = vmatprep.subr.mxu1 %v852_v10  ;;  %v1069_v10 = vld [vmem:[%s3620_s13 + $0x28] sm:$0xff] }
 0x5e7   :  { %2362 = vmatpush3.msra.mxu1 %v836_v11  ;;  %v1068_v11 = vld [vmem:[%s3620_s13 + $0x20] sm:$0xff] }
 0x5e8   :  { %2363 = vmatprep.subr.mxu1 %v851_v12  ;;  %v1067_v12 = vld [vmem:[%s3620_s13 + $0x18] sm:$0xff] }
 0x5e9   :  { %2364 = vmatpush3.msra.mxu1 %v835_v13  ;;  %v1066_v13 = vld [vmem:[%s3620_s13 + $0x10] sm:$0xff] }
 0x5ea   :  { %2365 = vmatprep.subr.mxu1 %v850_v14  ;;  %v1065_v14 = vld [vmem:[%s3620_s13 + $0x8] sm:$0xff] }
 0x5eb   :  { %2366 = vmatpush3.msra.mxu1 %v834_v15 }
 0x5ec   :  { %2367 = vmatprep.subr.mxu1 %v849_v16  ;;  %v1064_v16 = vld [vmem:[%s3620_s13] sm:$0xff] }
 0x5ed   :  { %2368 = vmatpush3.msra.mxu1 %v833_v17  ;;  %v1081_v17 = vld [vmem:[%s3620_s13 + $0x88] sm:$0xff]  ;;  %s2607_s13 = smov 80  }
 0x5ee   :  { %2369 = vmatprep.subr.mxu1 %v848_v19  ;;  %v1169_v19 = vld [vmem:[%s3621_s15 + $0x18] sm:$0xff] }
 0x5ef   :  { %2370 = vmatpush3.msra.mxu1 %v832_v20 }
 0x5f0   :  { %2371 = vmatprep.subr.mxu1 %v847_v22 }
 0x5f1   :  { %2372 = vmatpush3.msra.mxu1 %v831_v24 }
 0x5f2   :  { %2373 = vmatprep.subr.mxu1 %v846_v26 }
 0x5f3   :  { %2374 = vmatpush3.msra.mxu1 %v830_v27 }
 0x5f4   :  { %2375 = vmatprep.subr.mxu1 %v845_v29 }
 0x5f5   :  { %2376 = vmatpush3.msra.mxu1 %v829_v30 }
 0x5f6   :  { %2477 = vmatprep.subr.mxu1 %v2599_v0 }
 0x695   :  { %v697_v51 = vpop.f32.mrf.mxu1 }
 0x697   :  { %v770_v52 = vpop.f32.mrf.mxu0  ;;  %v2460_v53 = vpop.f32.mrf.mxu1 }
 0x698   :  { %v775_v54 = vrot.slane %v770_v52, 4 }
 0x699   :  { %v2465_v55 = vpop.f32.mrf.mxu0 }
 0x69a   :  { %v778_v56 = vsel %vm777_vm14, %v697_v51, %v775_v54 }
 0x69b   :  { %783 = vrot.lane.b32.xlu1 %v778_v56, %s2601_s29  ;;  %v2300_v56 = vld [vmem:[%s3619_s12] ss:$0 sm:$0xff] }
 0x70d   :  { %v784_v23 = vpop.permute.xlu1 %783 }
 0x70e   :  { %787 = vst.msk [vmem:[#allocation4 + $0x1] sm:$0xf] %vm786_vm15, %v784_v23  ;;  %vm1478_vm15 = vcmask 654336  }
 0x70f   :  { %790 = vst.msk [vmem:[#allocation4 + $0x5] sm:$0xf0] %vm789_vm2, %v784_v23  ;;  %vm1480_vm2 = vcmask 648192  }
 0x710   :  { %1479 = vst.msk [vmem:[#allocation6] sm:$0xff] %vm1478_vm15, %v2599_v0  ;;  %1482 = vst.msk [vmem:[#allocation6 + $0x10] sm:$0xff] %vm1478_vm15, %v2599_v0 }
 0x711   :  { %1481 = vst.msk [vmem:[#allocation6 + $0x8] sm:$0x3] %vm1480_vm2, %v2599_v0  ;;  %1483 = vst.msk [vmem:[#allocation6 + $0x18] sm:$0x3] %vm1480_vm2, %v2599_v0 }
 0x715   :  { %v792_v32 = vld [vmem:[#allocation4 + $0x1] sm:$0xf] }
 0x716   :  { %v807_v31 = vld [vmem:[#allocation4 + $0xa] sm:$0xf]  ;;  %v793_v35 = vld [vmem:[#allocation4 + $0x2] sm:$0xf] }
 0x717   :  { %v806_v33 = vld [vmem:[#allocation4 + $0x9] sm:$0xf]  ;;  %813 = vrot.lane.b32.xlu1 %v807_v31, %s2603_s7  ;;  %v791_v47 = vld [vmem:[#allocation4] sm:$0xf] }
 0x718   :  { %v2573_v34 = vpack.i.bf16 %v792_v32, %v806_v33  ;;  %v805_v40 = vld [vmem:[#allocation4 + $0x8] sm:$0xf] }
 0x71a   :  { %2574 = vrot.lane.b32.xlu0 %v2573_v34, %s2604_s30 }
 0x71e   :  { %799 = vrot.lane.b32.xlu0 %v793_v35, %s2603_s7 }
 0x789   :  { %v814_v36 = vpop.permute.xlu1 %813 }
 0x78a   :  { %v822_v41 = vrot.slane %v814_v36, 4 }
 0x78c   :  { %v2575_v37 = vpop.permute.xlu0 %2574 }
 0x78d   :  { %v2577_v38 = vunpack.i.h.bf16 %v2575_v37  ;;  %v2576_v39 = vunpack.i.l.bf16 %v2575_v37 }
 0x78f   :  { %v816_v42 = vsel %vm802_vm3, %v805_v40, %v2576_v39  ;;  %v817_v43 = vsel %vm193_vm6, %v2576_v39, %v814_v36  ;;  %v803_v50 = vsel %vm802_vm3, %v791_v47, %v2577_v38  ;;  %v1168_v40 = vld [vmem:[%s3621_s15 + $0x10] sm:$0xff] }
 0x790   :  { %v820_v44 = vrot.slane %v816_v42, 4  ;;  %v800_v45 = vpop.permute.xlu0 %799  ;;  %v821_v46 = vrot.slane %v817_v43, 4  ;;  %v1166_v42 = vld [vmem:[%s3621_s15] sm:$0xff] }
 0x791   :  { %v804_v48 = vsel %vm193_vm6, %v2577_v38, %v800_v45  ;;  %v828_v49 = vsel %vm777_vm14, %v800_v45, %v822_v41  ;;  %v1167_v41 = vld [vmem:[%s3621_s15 + $0x8] sm:$0xff]  ;;  %v2302_v43 = vld [vmem:[%s3622_s14] ss:$0 sm:$0xff] }
 0x792   :  { %2475 = vmatmul.mubr.msk.f32.vlgmr.msra.gmra.mxu0 %vm472_vm11, %v828_v49  ;;  %v827_v51 = vsel %vm777_vm14, %v804_v48, %v821_v46  ;;  %v826_v52 = vsel %vm777_vm14, %v803_v50, %v820_v44  ;;  %v1253_v48 = vld [vmem:[%s3623_s18 + $0x18] sm:$0xff]  ;;  %v1252_v50 = vld [vmem:[%s3623_s18 + $0x10] sm:$0xff] }
 0x793   :  { %939 = vmatprep.mubr.f32.mxu1 %v827_v51  ;;  %1094 = vmatpush1.msra.mxu0 %v1079_v63  ;;  %v1251_v51 = vld [vmem:[%s3623_s18 + $0x8] sm:$0xff]  ;;  %v1536_v63 = vld [vmem:[%s3626_s19 + $0x70] sm:$0xff] }
 0x794   :  { %940 = vmatmul.mubr.f32.vlgmr.msra.gmra.mxu1 %v826_v52  ;;  %1095 = vmatprep.subr.mxu0 %v2599_v0  ;;  %v1250_v52 = vld [vmem:[%s3623_s18] sm:$0xff] }
 0x795   :  { %2485 = vmatprep.mubr.msk.f32.mxu1 %vm2600_vm1, %v2599_v0  ;;  %1096 = vmatpush1.msra.mxu0 %v1078_v1 }
 0x796   :  { %1097 = vmatprep.subr.mxu0 %v2599_v0  ;;  %2478 = vmatpush3.msra.mxu1 %v1169_v19  ;;  %v1550_v19 = vld [vmem:[%s3626_s19 + $0xe0] sm:$0xff] }
 0x797   :  { %1098 = vmatpush1.msra.mxu0 %v1077_v2  ;;  %2479 = vmatprep.subr.mxu1 %v2599_v0 }
 0x798   :  { %1099 = vmatprep.subr.mxu0 %v2599_v0  ;;  %2480 = vmatpush3.msra.mxu1 %v1168_v40 }
 0x799   :  { %1100 = vmatpush1.msra.mxu0 %v1076_v3  ;;  %2481 = vmatprep.subr.mxu1 %v2599_v0  ;;  %v1535_v3 = vld [vmem:[%s3626_s19 + $0x68] sm:$0xff] }
 0x79a   :  { %1101 = vmatprep.subr.mxu0 %v2599_v0  ;;  %2482 = vmatpush3.msra.mxu1 %v1167_v41 }
 0x79b   :  { %1102 = vmatpush1.msra.mxu0 %v1075_v4  ;;  %2483 = vmatprep.subr.mxu1 %v2599_v0 }
 0x79c   :  { %1103 = vmatprep.subr.mxu0 %v2599_v0  ;;  %2484 = vmatpush3.msra.mxu1 %v1166_v42 }
 0x79d   :  { %1104 = vmatpush1.msra.mxu0 %v1074_v5  ;;  %2488 = vmatprep.subr.mxu1 %v2599_v0  ;;  %v1534_v5 = vld [vmem:[%s3626_s19 + $0x60] sm:$0xff] }
 0x79e   :  { %1105 = vmatprep.subr.mxu0 %v2599_v0 }
 0x79f   :  { %1106 = vmatpush1.msra.mxu0 %v1073_v6  ;;  %v1533_v6 = vld [vmem:[%s3626_s19 + $0x58] sm:$0xff] }
 0x7a0   :  { %1107 = vmatprep.subr.mxu0 %v2599_v0 }
 0x7a1   :  { %1108 = vmatpush1.msra.mxu0 %v1072_v7  ;;  %v1532_v7 = vld [vmem:[%s3626_s19 + $0x50] sm:$0xff] }
 0x7a2   :  { %1109 = vmatprep.subr.mxu0 %v2599_v0 }
 0x7a3   :  { %1110 = vmatpush1.msra.mxu0 %v1071_v8  ;;  %v1531_v8 = vld [vmem:[%s3626_s19 + $0x48] sm:$0xff] }
 0x7a4   :  { %1111 = vmatprep.subr.mxu0 %v2599_v0 }
 0x7a5   :  { %1112 = vmatpush1.msra.mxu0 %v1070_v9  ;;  %v1530_v9 = vld [vmem:[%s3626_s19 + $0x40] sm:$0xff] }
 0x7a6   :  { %1113 = vmatprep.subr.mxu0 %v2599_v0 }
 0x7a7   :  { %1114 = vmatpush1.msra.mxu0 %v1069_v10  ;;  %v1529_v10 = vld [vmem:[%s3626_s19 + $0x38] sm:$0xff] }
 0x7a8   :  { %1115 = vmatprep.subr.mxu0 %v2599_v0 }
 0x7a9   :  { %1116 = vmatpush1.msra.mxu0 %v1068_v11  ;;  %v1528_v11 = vld [vmem:[%s3626_s19 + $0x30] sm:$0xff] }
 0x7aa   :  { %1117 = vmatprep.subr.mxu0 %v2599_v0 }
 0x7ab   :  { %1118 = vmatpush1.msra.mxu0 %v1067_v12  ;;  %v1527_v12 = vld [vmem:[%s3626_s19 + $0x28] sm:$0xff] }
 0x7ac   :  { %1119 = vmatprep.subr.mxu0 %v2599_v0 }
 0x7ad   :  { %1120 = vmatpush1.msra.mxu0 %v1066_v13  ;;  %v1526_v13 = vld [vmem:[%s3626_s19 + $0x20] sm:$0xff] }
 0x7ae   :  { %1121 = vmatprep.subr.mxu0 %v2599_v0 }
 0x7af   :  { %1122 = vmatpush1.msra.mxu0 %v1065_v14  ;;  %v1525_v14 = vld [vmem:[%s3626_s19 + $0x18] sm:$0xff] }
 0x7b0   :  { %1123 = vmatprep.subr.mxu0 %v2599_v0 }
 0x7b1   :  { %1124 = vmatpush1.msra.mxu0 %v1064_v16  ;;  %v1523_v16 = vld [vmem:[%s3626_s19 + $0x8] sm:$0xff] }
 0x7b2   :  { %1153 = vmatprep.subr.mxu0 %v2599_v0 }
 0x7b3   :  { %1154 = vmatpush2.msra.mxu0 %v1081_v17  ;;  %v1522_v17 = vld [vmem:[%s3626_s19] sm:$0xff] }
 0x7b4   :  { %1155 = vmatprep.subr.mxu0 %v2599_v0 }
 0x7b5   :  { %1156 = vmatpush2.msra.mxu0 %v1080_v18  ;;  %v1551_v18 = vld [vmem:[%s3626_s19 + $0xe8] sm:$0xff] }
 0x7b6   :  { %2499 = vmatprep.subr.mxu0 %v2599_v0 }
 0x852   :  { %v1011_v53 = vpop.f32.mrf.mxu0 }
 0x854   :  { %v2377_v54 = vpop.f32.mrf.mxu1  ;;  %v2476_v55 = vpop.f32.mrf.mxu0 }
 0x856   :  { %v2378_v57 = vpop.f32.mrf.mxu1 }
 0x857   :  { %v2379_v58 = vadd.f32 %v2378_v57, %v2377_v54  ;;  %v1327_v57 = vld [vmem:[%s3625_s17] sm:$0xff] }
 0x859   :  { %v942_v59 = vadd.f32 %v2379_v58, %v2300_v56 }
 0x85b   :  { %v1012_v60 = vadd.f32 %v1011_v53, %v942_v59  ;;  %v2304_v53 = vld [vmem:[%s3624_s16] ss:$0 sm:$0xff] }
 0x85d   :  { %vm1015_vm5 = vcmp.ge.f32.partialorder %v1012_v60, 0.0  ;;  %v1016_v61 = vmul.f32 0.01, %v1012_v60 }
 0x85f   :  { %v1017_v62 = vsel %vm1015_vm5, %v1012_v60, %v1016_v61 }
 0x860   :  { %1022 = vrot.lane.b32.xlu1 %v1017_v62, %s2605_s5  ;;  %v1537_v62 = vld [vmem:[%s3626_s19 + $0x78] sm:$0xff] }
 0x8d2   :  { %v1023_v15 = vpop.permute.xlu1 %1022 }
 0x8d3   :  { %1026 = vst.msk [vmem:[#allocation5 + $0x1] sm:$0xf] %vm1025_vm7, %v1023_v15 }
 0x8d4   :  { %1029 = vst.msk [vmem:[#allocation5 + $0x5] sm:$0xf0] %vm1028_vm8, %v1023_v15  ;;  %v1524_v15 = vld [vmem:[%s3626_s19 + $0x10] sm:$0xff] }
 0x8da   :  { %v1031_v21 = vld [vmem:[#allocation5 + $0x1] sm:$0xf] }
 0x8db   :  { %v1046_v20 = vld [vmem:[#allocation5 + $0xa] sm:$0xf]  ;;  %v1032_v24 = vld [vmem:[#allocation5 + $0x2] sm:$0xf] }
 0x8dc   :  { %v1045_v22 = vld [vmem:[#allocation5 + $0x9] sm:$0xf]  ;;  %1052 = vrot.lane.b32.xlu1 %v1046_v20, %s2604_s30  ;;  %v1030_v30 = vld [vmem:[#allocation5] sm:$0xf]  ;;  %v1549_v20 = vld [vmem:[%s3626_s19 + $0xd8] sm:$0xff] }
 0x8dd   :  { %v2578_v23 = vpack.i.bf16 %v1031_v21, %v1045_v22  ;;  %v1044_v29 = vld [vmem:[#allocation5 + $0x8] sm:$0xf]  ;;  %v1548_v21 = vld [vmem:[%s3626_s19 + $0xd0] sm:$0xff] }
 0x8de   :  { %v1547_v22 = vld [vmem:[%s3626_s19 + $0xc8] sm:$0xff] }
 0x8df   :  { %2579 = vrot.lane.b32.xlu0 %v2578_v23, %s2606_s11  ;;  %v1546_v23 = vld [vmem:[%s3626_s19 + $0xc0] sm:$0xff] }
 0x8e3   :  { %1038 = vrot.lane.b32.xlu0 %v1032_v24, %s2604_s30  ;;  %v1545_v24 = vld [vmem:[%s3626_s19 + $0xb8] sm:$0xff] }
 0x94e   :  { %v1053_v25 = vpop.permute.xlu1 %1052 }
 0x94f   :  { %v1059_v31 = vrot.slane %v1053_v25, 4 }
 0x951   :  { %v2580_v26 = vpop.permute.xlu0 %2579 }
 0x952   :  { %v2582_v27 = vunpack.i.h.bf16 %v2580_v26  ;;  %v2581_v28 = vunpack.i.l.bf16 %v2580_v26  ;;  %v1543_v26 = vld [vmem:[%s3626_s19 + $0xa8] sm:$0xff] }
 0x954   :  { %v1055_v32 = vsel %vm1041_vm9, %v1044_v29, %v2581_v28  ;;  %v1042_v33 = vsel %vm1041_vm9, %v1030_v30, %v2582_v27  ;;  %v1542_v27 = vld [vmem:[%s3626_s19 + $0xa0] sm:$0xff]  ;;  %v1541_v28 = vld [vmem:[%s3626_s19 + $0x98] sm:$0xff]  ;;  %v1540_v29 = vld [vmem:[%s3626_s19 + $0x90] sm:$0xff] }
 0x955   :  { %v1039_v34 = vpop.permute.xlu0 %1038  ;;  %v1056_v35 = vsel %vm802_vm3, %v1055_v32, %v1053_v25  ;;  %v1544_v25 = vld [vmem:[%s3626_s19 + $0xb0] sm:$0xff]  ;;  %v1539_v30 = vld [vmem:[%s3626_s19 + $0x88] sm:$0xff] }
 0x956   :  { %v1043_v36 = vsel %vm802_vm3, %v1042_v33, %v1039_v34  ;;  %v1063_v37 = vsel %vm777_vm14, %v1039_v34, %v1059_v31  ;;  %v1058_v38 = vrot.slane %v1056_v35, 4  ;;  %v1538_v31 = vld [vmem:[%s3626_s19 + $0x80] sm:$0xff] }
 0x957   :  { %2303 = vmatprep.mubr.msk.f32.mxu0 %vm1089_vm10, %v1063_v37 }
 0x958   :  { %v1062_v39 = vsel %vm777_vm14, %v1043_v36, %v1058_v38 }
 0x959   :  { %1158 = vmatmul.mubr.f32.vlgmr.msra.gmra.mxu0 %v1062_v39 }
 0x95a   :  { %2501 = vmatprep.mubr.msk.f32.mxu0 %vm2600_vm1, %v2599_v0 }
 0xa19   :  { %v1159_v44 = vpop.f32.mrf.mxu0 }
 0xa1a   :  { %v1160_v45 = vadd.f32 %v2302_v43, %v1159_v44 }
 0xa1b   :  { %v1161_v46 = vpop.f32.mrf.mxu0 }
 0xa1c   :  { %vm1163_vm12 = vcmp.ge.f32.partialorder %v1160_v45, 0.0  ;;  %v1164_v47 = vmul.f32 0.01, %v1160_v45 }
 0xa1e   :  { %v1165_v49 = vsel %vm1163_vm12, %v1160_v45, %v1164_v47  ;;  %v1650_v47 = vld [vmem:[%s3627_s21 + $0x18] sm:$0xff] }
 0xa1f   :  { %2486 = vmatmul.mubr.msk.f32.vlgmr.msra.gmra.mxu1 %vm472_vm11, %v1165_v49  ;;  %v1648_v49 = vld [vmem:[%s3627_s21 + $0x8] sm:$0xff] }
 0xa20   :  { %2489 = vmatpush3.msra.mxu1 %v1253_v48  ;;  %2496 = vmatprep.mubr.msk.f32.mxu1 %vm2600_vm1, %v2599_v0  ;;  %v1649_v48 = vld [vmem:[%s3627_s21 + $0x10] sm:$0xff] }
 0xa21   :  { %2490 = vmatprep.subr.mxu1 %v2599_v0 }
 0xa22   :  { %2491 = vmatpush3.msra.mxu1 %v1252_v50  ;;  %v1647_v50 = vld [vmem:[%s3627_s21] sm:$0xff] }
 0xa23   :  { %2492 = vmatprep.subr.mxu1 %v2599_v0 }
 0xa24   :  { %2493 = vmatpush3.msra.mxu1 %v1251_v51  ;;  %v1742_v51 = vld [vmem:[%s3628_s24 + $0x18] sm:$0xff] }
 0xa25   :  { %2494 = vmatprep.subr.mxu1 %v2599_v0 }
 0xa26   :  { %2495 = vmatpush3.msra.mxu1 %v1250_v52  ;;  %v2311_v52 = vld [vmem:[%s3629_s20] ss:$0 sm:$0xff] }
 0xa27   :  { %2504 = vmatprep.subr.mxu1 %v2599_v0 }
 0xadf   :  { %v1246_v54 = vpop.f32.mrf.mxu1 }
 0xae0   :  { %v1247_v55 = vadd.f32 %v2304_v53, %v1246_v54 }
 0xae1   :  { %v2487_v56 = vpop.f32.mrf.mxu1 }
 0xae2   :  { %2497 = vmatmul.mubr.msk.f32.vlgmr.msra.gmra.mxu1 %vm472_vm11, %v1247_v55 }
 0xae3   :  { %2506 = vmatprep.mubr.msk.f32.mxu1 %vm2600_vm1, %v2599_v0  ;;  %vm1488_vm1 = vcmask 588864  }
 0xba2   :  { %v1323_v58 = vpop.f32.mrf.mxu1 }
 0xba3   :  { %v1405_v59 = vrot.slane %v1323_v58, 4  ;;  %2500 = vmatpush3.msk.msra.mxu0 %vm777_vm14, %v1323_v58 }
 0xba4   :  { %v2498_v60 = vpop.f32.mrf.mxu1  ;;  %2502 = vmatmul.mubr.msk.f32.vlgmr.msra.gmra.mxu0 %vm1328_vm13, %v1327_v57  ;;  %1566 = vmatprep.subr.mxu0 %v2599_v0 }
 0xba5   :  { %2505 = vmatpush3.msk.msra.mxu1 %vm777_vm14, %v1405_v59  ;;  %1567 = vmatpush1.msra.mxu0 %v1537_v62  ;;  %vm1559_vm14 = vcmask 916480  }
 0xba6   :  { %2507 = vmatmul.mubr.msk.f32.vlgmr.msra.gmra.mxu1 %vm1328_vm13, %v1327_v57  ;;  %1568 = vmatprep.subr.mxu0 %v2599_v0 }
 0xba7   :  { %1569 = vmatpush1.msra.mxu0 %v1536_v63  ;;  %2509 = vmatprep.subr.mxu1 %v1650_v47  ;;  %v1741_v63 = vld [vmem:[%s3628_s24 + $0x10] sm:$0xff] }
 0xba8   :  { %1570 = vmatprep.subr.mxu0 %v2599_v0  ;;  %2510 = vmatpush3.msra.mxu1 %v1650_v47 }
 0xba9   :  { %1571 = vmatpush1.msra.mxu0 %v1535_v3  ;;  %2511 = vmatprep.subr.mxu1 %v1649_v48 }
 0xbaa   :  { %1572 = vmatprep.subr.mxu0 %v2599_v0  ;;  %2512 = vmatpush3.msra.mxu1 %v1649_v48 }
 0xbab   :  { %1573 = vmatpush1.msra.mxu0 %v1534_v5  ;;  %2513 = vmatprep.subr.mxu1 %v1648_v49 }
 0xbac   :  { %1574 = vmatprep.subr.mxu0 %v2599_v0  ;;  %2514 = vmatpush3.msra.mxu1 %v1648_v49 }
 0xbad   :  { %1575 = vmatpush1.msra.mxu0 %v1533_v6  ;;  %2515 = vmatprep.subr.mxu1 %v1647_v50 }
 0xbae   :  { %1576 = vmatprep.subr.mxu0 %v2599_v0  ;;  %2516 = vmatpush3.msra.mxu1 %v1647_v50 }
 0xbaf   :  { %1577 = vmatpush1.msra.mxu0 %v1532_v7  ;;  %2520 = vmatprep.subr.mxu1 %v1742_v51 }
 0xbb0   :  { %1578 = vmatprep.subr.mxu0 %v2599_v0 }
 0xbb1   :  { %1579 = vmatpush1.msra.mxu0 %v1531_v8  ;;  %v1824_v8 = vld [vmem:[%s3631_s23] sm:$0xff] }
 0xbb2   :  { %1580 = vmatprep.subr.mxu0 %v2599_v0 }
 0xbb3   :  { %1581 = vmatpush1.msra.mxu0 %v1530_v9 }
 0xbb4   :  { %1582 = vmatprep.subr.mxu0 %v2599_v0 }
 0xbb5   :  { %1583 = vmatpush1.msra.mxu0 %v1529_v10 }
 0xbb6   :  { %1584 = vmatprep.subr.mxu0 %v2599_v0 }
 0xbb7   :  { %1585 = vmatpush1.msra.mxu0 %v1528_v11  ;;  %v1825_v11 = vld [vmem:[%s3631_s23 + $0x8] sm:$0xff] }
 0xbb8   :  { %1586 = vmatprep.subr.mxu0 %v2599_v0 }
 0xbb9   :  { %1587 = vmatpush1.msra.mxu0 %v1527_v12  ;;  %v1989_v12 = vld [vmem:[%s3632_s25 + $0x38] sm:$0xff] }
 0xbba   :  { %1588 = vmatprep.subr.mxu0 %v2599_v0 }
 0xbbb   :  { %1589 = vmatpush1.msra.mxu0 %v1526_v13  ;;  %v1988_v13 = vld [vmem:[%s3632_s25 + $0x30] sm:$0xff] }
 0xbbc   :  { %1590 = vmatprep.subr.mxu0 %v2599_v0 }
 0xbbd   :  { %1591 = vmatpush1.msra.mxu0 %v1525_v14  ;;  %v1987_v14 = vld [vmem:[%s3632_s25 + $0x28] sm:$0xff] }
 0xbbe   :  { %1592 = vmatprep.subr.mxu0 %v2599_v0 }
 0xbbf   :  { %1593 = vmatpush1.msra.mxu0 %v1524_v15  ;;  %v1986_v15 = vld [vmem:[%s3632_s25 + $0x20] sm:$0xff] }
 0xbc0   :  { %1594 = vmatprep.subr.mxu0 %v2599_v0 }
 0xbc1   :  { %1595 = vmatpush1.msra.mxu0 %v1523_v16  ;;  %v1985_v16 = vld [vmem:[%s3632_s25 + $0x18] sm:$0xff] }
 0xbc2   :  { %1596 = vmatprep.subr.mxu0 %v2599_v0 }
 0xbc3   :  { %1597 = vmatpush1.msra.mxu0 %v1522_v17  ;;  %v1984_v17 = vld [vmem:[%s3632_s25 + $0x10] sm:$0xff] }
 0xbc4   :  { %1602 = vmatprep.subr.mxu0 %v2599_v0 }
 0xbc5   :  { %1603 = vmatpush2.msra.mxu0 %v1551_v18  ;;  %v1983_v18 = vld [vmem:[%s3632_s25 + $0x8] sm:$0xff] }
 0xbc6   :  { %1604 = vmatprep.subr.mxu0 %v2599_v0 }
 0xbc7   :  { %1605 = vmatpush2.msra.mxu0 %v1550_v19  ;;  %v1982_v19 = vld [vmem:[%s3632_s25] sm:$0xff] }
 0xbc8   :  { %1606 = vmatprep.subr.mxu0 %v2599_v0 }
 0xbc9   :  { %1607 = vmatpush2.msra.mxu0 %v1549_v20 }
 0xbca   :  { %1608 = vmatprep.subr.mxu0 %v2599_v0 }
 0xbcb   :  { %1609 = vmatpush2.msra.mxu0 %v1548_v21 }
 0xbcc   :  { %1610 = vmatprep.subr.mxu0 %v2599_v0 }
 0xbcd   :  { %1611 = vmatpush2.msra.mxu0 %v1547_v22 }
 0xbce   :  { %1612 = vmatprep.subr.mxu0 %v2599_v0 }
 0xbcf   :  { %1613 = vmatpush2.msra.mxu0 %v1546_v23 }
 0xbd0   :  { %1614 = vmatprep.subr.mxu0 %v2599_v0 }
 0xbd1   :  { %1615 = vmatpush2.msra.mxu0 %v1545_v24  ;;  %v2323_v24 = vld [vmem:[%s3633_s26] ss:$0 sm:$0xff] }
 0xbd2   :  { %1616 = vmatprep.subr.mxu0 %v2599_v0 }
 0xbd3   :  { %1617 = vmatpush2.msra.mxu0 %v1544_v25 }
 0xbd4   :  { %1618 = vmatprep.subr.mxu0 %v2599_v0 }
 0xbd5   :  { %1619 = vmatpush2.msra.mxu0 %v1543_v26 }
 0xbd6   :  { %1620 = vmatprep.subr.mxu0 %v2599_v0 }
 0xbd7   :  { %1621 = vmatpush2.msra.mxu0 %v1542_v27 }
 0xbd8   :  { %1622 = vmatprep.subr.mxu0 %v2599_v0 }
 0xbd9   :  { %1623 = vmatpush2.msra.mxu0 %v1541_v28 }
 0xbda   :  { %1624 = vmatprep.subr.mxu0 %v2599_v0 }
 0xbdb   :  { %1625 = vmatpush2.msra.mxu0 %v1540_v29 }
 0xbdc   :  { %1626 = vmatprep.subr.mxu0 %v2599_v0 }
 0xbdd   :  { %1627 = vmatpush2.msra.mxu0 %v1539_v30 }
 0xbde   :  { %1628 = vmatprep.subr.mxu0 %v2599_v0 }
 0xbdf   :  { %1629 = vmatpush2.msra.mxu0 %v1538_v31 }
 0xc64   :  { %v1401_v61 = vpop.f32.mrf.mxu0 }
 0xc65   :  { %1485 = vrot.lane.b32.xlu1 %v1401_v61, %s2605_s5 }
 0xc66   :  { %v2503_v1 = vpop.f32.mrf.mxu0  ;;  %v1474_v2 = vpop.f32.mrf.mxu1 }
 0xc67   :  { %1491 = vrot.lane.b32.xlu0 %v1474_v2, %s2605_s5  ;;  %s2608_s5 = smov 32   ;;  %v1740_v1 = vld [vmem:[%s3628_s24 + $0x8] sm:$0xff]  ;;  %v1739_v2 = vld [vmem:[%s3628_s24] sm:$0xff] }
 0xc68   :  { %v2508_v4 = vpop.f32.mrf.mxu1 }
 0xc69   :  { %v2314_v4 = vld [vmem:[%s3630_s22] ss:$0 sm:$0xff] }
 0xcd7   :  { %v1486_v32 = vpop.permute.xlu1 %1485 }
 0xcd8   :  { %1489 = vst.msk [vmem:[#allocation6 + $0x1] sm:$0xff] %vm1488_vm1, %v1486_v32 }
 0xcd9   :  { %v1492_v33 = vpop.permute.xlu0 %1491 }
 0xcda   :  { %1495 = vst.msk [vmem:[#allocation6 + $0x11] sm:$0xff] %vm1488_vm1, %v1492_v33 }
 0xcdf   :  { %v1497_v34 = vld [vmem:[#allocation6 + $0x1] sm:$0xff] }
 0xce0   :  { %v1498_v35 = vld [vmem:[#allocation6 + $0x2] sm:$0xff]  ;;  %1500 = vrot.lane.b32.xlu1 %v1497_v34, %s2607_s13 }
 0xce1   :  { %1504 = vrot.lane.b32.xlu0 %v1498_v35, %s2608_s5  ;;  %v1511_v36 = vld [vmem:[#allocation6 + $0x12] sm:$0xff]  ;;  %v1496_v38 = vld [vmem:[#allocation6] sm:$0xff] }
 0xce2   :  { %v1510_v0 = vld [vmem:[#allocation6 + $0x11] sm:$0xff] }
 0xce3   :  { %v1509_v44 = vld [vmem:[#allocation6 + $0x10] sm:$0xff] }
 0xce4   :  { %1513 = vrot.lane.b32.xlu1 %v1510_v0, %s2607_s13 }
 0xce5   :  { %1517 = vrot.lane.b32.xlu0 %v1511_v36, %s2608_s5 }
 0xd52   :  { %v1501_v37 = vpop.permute.xlu1 %1500 }
 0xd53   :  { %v1505_v39 = vpop.permute.xlu0 %1504  ;;  %v1507_v40 = vsel %vm1478_vm15, %v1496_v38, %v1501_v37 }
 0xd54   :  { %v1508_v41 = vsel %vm472_vm11, %v1501_v37, %v1505_v39 }
 0xd55   :  { %2312 = vmatprep.mubr.msk.f32.mxu0 %vm1559_vm14, %v1508_v41 }
 0xd56   :  { %1631 = vmatmul.mubr.f32.vlgmr.msra.gmra.mxu0 %v1507_v40  ;;  %v1514_v42 = vpop.permute.xlu1 %1513 }
 0xd57   :  { %v1518_v43 = vpop.permute.xlu0 %1517  ;;  %v1520_v46 = vsel %vm1478_vm15, %v1509_v44, %v1514_v42 }
 0xd58   :  { %v1521_v45 = vsel %vm472_vm11, %v1514_v42, %v1518_v43 }
 0xd59   :  { %2313 = vmatprep.mubr.msk.f32.mxu0 %vm1559_vm14, %v1521_v45 }
 0xd5a   :  { %1636 = vmatmul.mubr.f32.gmra.mxu0 %v1520_v46 }
 0xe16   :  { %v1632_v53 = vpop.f32.mrf.mxu0 }
 0xe17   :  { %v1633_v54 = vadd.f32 %v2311_v52, %v1632_v53 }
 0xe18   :  { %v1634_v55 = vpop.f32.mrf.mxu0 }
 0xe19   :  { %vm1641_vm4 = vcmp.ge.f32.partialorder %v1633_v54, 0.0  ;;  %v1643_v56 = vmul.f32 0.01, %v1633_v54 }
 0xe1a   :  { %v1637_v57 = vpop.f32.mrf.mxu0 }
 0xe1b   :  { %v1638_v58 = vadd.f32 %v2311_v52, %v1637_v57  ;;  %v1645_v59 = vsel %vm1641_vm4, %v1633_v54, %v1643_v56 }
 0xe1c   :  { %v1639_v60 = vpop.f32.mrf.mxu0  ;;  %2517 = vmatprep.mubr.msk.f32.mxu1 %vm472_vm11, %v1645_v59 }
 0xe1d   :  { %vm1642_vm5 = vcmp.ge.f32.partialorder %v1638_v58, 0.0  ;;  %v1644_v61 = vmul.f32 0.01, %v1638_v58 }
 0xe1f   :  { %v1646_v62 = vsel %vm1642_vm5, %v1638_v58, %v1644_v61 }
 0xe20   :  { %2518 = vmatmul.mubr.msk.f32.vlgmr.msra.gmra.mxu1 %vm472_vm11, %v1646_v62 }
 0xe21   :  { %2521 = vmatpush3.msra.mxu1 %v1742_v51 }
 0xe22   :  { %2522 = vmatprep.subr.mxu1 %v1741_v63 }
 0xe23   :  { %2523 = vmatpush3.msra.mxu1 %v1741_v63 }
 0xe24   :  { %2524 = vmatprep.subr.mxu1 %v1740_v1 }
 0xe25   :  { %2525 = vmatpush3.msra.mxu1 %v1740_v1 }
 0xe26   :  { %2526 = vmatprep.subr.mxu1 %v1739_v2 }
 0xe27   :  { %2527 = vmatpush3.msra.mxu1 %v1739_v2 }
 0xee0   :  { %v2519_v3 = vpop.f32.mrf.mxu1 }
 0xee1   :  { %v1736_v7 = vadd.f32 %v2519_v3, %v2314_v4 }
 0xee2   :  { %v1730_v5 = vpop.f32.mrf.mxu1 }
 0xee3   :  { %v1731_v6 = vadd.f32 %v2314_v4, %v1730_v5 }
 0xee5   :  { %2528 = vmatprep.mubr.msk.f32.mxu1 %vm472_vm11, %v1731_v6 }
 0xee6   :  { %2529 = vmatmul.mubr.msk.f32.vlgmr.msra.gmra.mxu1 %vm472_vm11, %v1736_v7 }
 0xee7   :  { %2533 = vmatprep.mubr.msk.f32.mxu1 %vm95_vm0, %v1824_v8 }
 0xfa6   :  { %v2530_v9 = vpop.f32.mrf.mxu1 }
 0xfa8   :  { %v1815_v10 = vpop.f32.mrf.mxu1 }
 0xfa9   :  { %2531 = vmatprep.subr.mxu1 %v1815_v10 }
 0xfaa   :  { %2532 = vmatpush3.msra.mxu1 %v1815_v10 }
 0xfab   :  { %2534 = vmatmul.mubr.msk.f32.vlgmr.msra.gmra.mxu1 %vm95_vm0, %v1825_v11  ;;  %2536 = vmatprep.subr.mxu1 %v2530_v9 }
 0xfac   :  { %2537 = vmatpush3.msra.mxu1 %v2530_v9  ;;  %2538 = vmatprep.mubr.msk.f32.mxu1 %vm95_vm0, %v1824_v8 }
 0xfad   :  { %2541 = vmatprep.subr.mxu1 %v1989_v12 }
 0xfaf   :  { %2539 = vmatmul.mubr.msk.f32.vlgmr.msra.gmra.mxu1 %vm95_vm0, %v1825_v11  ;;  %vm2268_vm0 = vcmask 1040384  }
 0xfb0   :  { %2542 = vmatpush3.msra.mxu1 %v1989_v12 }
 0xfb1   :  { %2543 = vmatprep.subr.mxu1 %v1988_v13 }
 0xfb2   :  { %2544 = vmatpush3.msra.mxu1 %v1988_v13 }
 0xfb3   :  { %2545 = vmatprep.subr.mxu1 %v1987_v14 }
 0xfb4   :  { %2546 = vmatpush3.msra.mxu1 %v1987_v14 }
 0xfb5   :  { %2547 = vmatprep.subr.mxu1 %v1986_v15 }
 0xfb6   :  { %2548 = vmatpush3.msra.mxu1 %v1986_v15 }
 0xfb7   :  { %2549 = vmatprep.subr.mxu1 %v1985_v16 }
 0xfb8   :  { %2550 = vmatpush3.msra.mxu1 %v1985_v16 }
 0xfb9   :  { %2551 = vmatprep.subr.mxu1 %v1984_v17 }
 0xfba   :  { %2552 = vmatpush3.msra.mxu1 %v1984_v17 }
 0xfbb   :  { %2553 = vmatprep.subr.mxu1 %v1983_v18 }
 0xfbc   :  { %2554 = vmatpush3.msra.mxu1 %v1983_v18 }
 0xfbd   :  { %2555 = vmatprep.subr.mxu1 %v1982_v19 }
 0xfbe   :  { %2556 = vmatpush3.msra.mxu1 %v1982_v19 }
0x106b   :  { %v2535_v20 = vpop.f32.mrf.mxu1 }
0x106d   :  { %v1898_v21 = vpop.f32.mrf.mxu1 }
0x106e   :  { %2557 = vmatprep.mubr.msk.f32.mxu1 %vm193_vm6, %v1898_v21 }
0x106f   :  { %2558 = vmatmul.mubr.msk.f32.vlgmr.msra.gmra.mxu1 %vm193_vm6, %v2535_v20  ;;  %v2540_v22 = vpop.f32.mrf.mxu1 }
0x1071   :  { %v1973_v23 = vpop.f32.mrf.mxu1 }
0x1072   :  { %2560 = vmatprep.mubr.msk.f32.mxu1 %vm193_vm6, %v1973_v23 }
0x1073   :  { %2561 = vmatmul.mubr.msk.f32.gmra.mxu1 %vm193_vm6, %v2540_v22 }
0x112f   :  { %v2559_v25 = vpop.f32.mrf.mxu1 }
0x1130   :  { %v2081_v26 = vadd.f32 %v2559_v25, %v2323_v24 }
0x1131   :  { %v2075_v27 = vpop.f32.mrf.mxu1 }
0x1132   :  { %v2095_v28 = vsub.f32 0.0, %v2081_v26  ;;  %v2076_v29 = vadd.f32 %v2323_v24, %v2075_v27 }
0x1133   :  { %v2562_v32 = vpop.f32.mrf.mxu1 }
0x1134   :  { %v2100_v30 = vmul.f32 1.442695, %v2095_v28  ;;  %v2094_v31 = vsub.f32 0.0, %v2076_v29  ;;  %v2091_v35 = vadd.f32 %v2562_v32, %v2323_v24 }
0x1135   :  { %v2085_v34 = vpop.f32.mrf.mxu1 }
0x1136   :  { %2583 = vpow2.f32 %v2100_v30  ;;  %v2098_v33 = vmul.f32 1.442695, %v2094_v31  ;;  %v2086_v36 = vadd.f32 %v2323_v24, %v2085_v34  ;;  %v2097_v0 = vsub.f32 0.0, %v2091_v35 }
0x1138   :  { %2585 = vpow2.f32 %v2098_v33  ;;  %v2096_v37 = vsub.f32 0.0, %v2086_v36  ;;  %v2104_v38 = vmul.f32 1.442695, %v2097_v0 }
0x113a   :  { %v2102_v40 = vmul.f32 1.442695, %v2096_v37  ;;  %2587 = vpow2.f32 %v2104_v38 }
0x1143   :  { %v2584_v39 = vpop.eup %2583 }
0x1144   :  { %v2107_v41 = vadd.f32 1.0, %v2584_v39 }
0x1145   :  { %v2586_v42 = vpop.eup %2585 }
0x1146   :  { %2589 = vrcp.f32 %v2107_v41  ;;  %v2106_v43 = vadd.f32 1.0, %v2586_v42 }
0x1147   :  { %2591 = vpow2.f32 %v2102_v40  ;;  %v2588_v44 = vpop.eup %2587 }
0x1148   :  { %2593 = vrcp.f32 %v2106_v43  ;;  %v2109_v50 = vadd.f32 1.0, %v2588_v44 }
0x114a   :  { %2595 = vrcp.f32 %v2109_v50 }
0x1153   :  { %v2590_v45 = vpop.eup %2589 }
0x1154   :  { %v2592_v46 = vpop.eup %2591  ;;  %v3518_v47 = vmin.f32 %v2590_v45, 1.0 }
0x1155   :  { %v2594_v48 = vpop.eup %2593  ;;  %v2108_v52 = vadd.f32 1.0, %v2592_v46 }
0x1156   :  { %v3520_v49 = vmin.f32 %v2594_v48, 1.0  ;;  %v2148_v51 = vrot.slane %v3518_v47, 1  ;;  %v2152_v54 = vrot.slane %v3518_v47, 2  ;;  %v2156_v56 = vrot.slane %v3518_v47, 3 }
0x1157   :  { %2597 = vrcp.f32 %v2108_v52  ;;  %v2160_v58 = vrot.slane %v3518_v47, 4  ;;  %v2164_v60 = vrot.slane %v3518_v47, 5  ;;  %v2596_v61 = vpop.eup %2595  ;;  %v2168_v2 = vrot.slane %v3518_v47, 6 }
0x1158   :  { %2149 = vrot.lane.b32.xlu0 %v2148_v51, %s2601_s29  ;;  %v2119_v53 = vrot.slane %v3520_v49, 1  ;;  %v2123_v55 = vrot.slane %v3520_v49, 2  ;;  %v2127_v57 = vrot.slane %v3520_v49, 3  ;;  %v2131_v59 = vrot.slane %v3520_v49, 4 }
0x1159   :  { %v2135_v62 = vrot.slane %v3520_v49, 5  ;;  %v3541_v1 = vmin.f32 %v2596_v61, 1.0  ;;  %v2139_v4 = vrot.slane %v3520_v49, 6  ;;  %v2172_v19 = vrot.slane %v3518_v47, 7 }
0x115a   :  { %2120 = vrot.lane.b32.xlu1 %v2119_v53, %s2601_s29  ;;  %v2143_v20 = vrot.slane %v3520_v49, 7 }
0x115b   :  { %v2220_v5 = vrot.slane %v3541_v1, 1  ;;  %v2224_v7 = vrot.slane %v3541_v1, 2  ;;  %v2228_v9 = vrot.slane %v3541_v1, 3  ;;  %v2232_v11 = vrot.slane %v3541_v1, 4 }
0x115c   :  { %2153 = vrot.lane.b32.xlu0 %v2152_v54, %s2608_s5  ;;  %v2236_v13 = vrot.slane %v3541_v1, 5  ;;  %v2240_v15 = vrot.slane %v3541_v1, 6  ;;  %v2244_v17 = vrot.slane %v3541_v1, 7 }
0x115e   :  { %2124 = vrot.lane.b32.xlu1 %v2123_v55, %s2608_s5 }
0x1160   :  { %2157 = vrot.lane.b32.xlu0 %v2156_v56, %s2606_s11 }
0x1162   :  { %2128 = vrot.lane.b32.xlu1 %v2127_v57, %s2606_s11 }
0x1164   :  { %2161 = vrot.lane.b32.xlu0 %v2160_v58, %s2603_s7  ;;  %v2598_v63 = vpop.eup %2597 }
0x1165   :  { %v2116_v3 = vmin.f32 %v2598_v63, 1.0 }
0x1166   :  { %2132 = vrot.lane.b32.xlu1 %v2131_v59, %s2603_s7 }
0x1167   :  { %v2191_v6 = vrot.slane %v2116_v3, 1  ;;  %v2195_v8 = vrot.slane %v2116_v3, 2  ;;  %v2199_v10 = vrot.slane %v2116_v3, 3  ;;  %v2203_v12 = vrot.slane %v2116_v3, 4 }
0x1168   :  { %2165 = vrot.lane.b32.xlu0 %v2164_v60, %s2607_s13  ;;  %v2207_v14 = vrot.slane %v2116_v3, 5  ;;  %v2211_v16 = vrot.slane %v2116_v3, 6  ;;  %v2215_v18 = vrot.slane %v2116_v3, 7 }
0x116a   :  { %2136 = vrot.lane.b32.xlu1 %v2135_v62, %s2607_s13 }
0x116c   :  { %2169 = vrot.lane.b32.xlu0 %v2168_v2, %s2604_s30 }
0x116e   :  { %2140 = vrot.lane.b32.xlu1 %v2139_v4, %s2604_s30 }
0x1170   :  { %2221 = vrot.lane.b32.xlu0 %v2220_v5, %s2601_s29 }
0x1172   :  { %2192 = vrot.lane.b32.xlu1 %v2191_v6, %s2601_s29 }
0x1174   :  { %2225 = vrot.lane.b32.xlu0 %v2224_v7, %s2608_s5 }
0x1176   :  { %2196 = vrot.lane.b32.xlu1 %v2195_v8, %s2608_s5 }
0x1178   :  { %2229 = vrot.lane.b32.xlu0 %v2228_v9, %s2606_s11 }
0x117a   :  { %2200 = vrot.lane.b32.xlu1 %v2199_v10, %s2606_s11 }
0x117c   :  { %2233 = vrot.lane.b32.xlu0 %v2232_v11, %s2603_s7 }
0x117e   :  { %2204 = vrot.lane.b32.xlu1 %v2203_v12, %s2603_s7 }
0x1180   :  { %2237 = vrot.lane.b32.xlu0 %v2236_v13, %s2607_s13 }
0x1182   :  { %2208 = vrot.lane.b32.xlu1 %v2207_v14, %s2607_s13 }
0x1184   :  { %2241 = vrot.lane.b32.xlu0 %v2240_v15, %s2604_s30 }
0x1186   :  { %2212 = vrot.lane.b32.xlu1 %v2211_v16, %s2604_s30 }
0x1188   :  { %2245 = vrot.lane.b32.xlu0 %v2244_v17, %s2602_s1 }
0x118a   :  { %2216 = vrot.lane.b32.xlu1 %v2215_v18, %s2602_s1 }
0x118c   :  { %2173 = vrot.lane.b32.xlu0 %v2172_v19, %s2602_s1 }
0x118e   :  { %2144 = vrot.lane.b32.xlu1 %v2143_v20, %s2602_s1 }
0x11ca   :  { %v2150_v21 = vpop.permute.xlu0 %2149 }
0x11cb   :  { %v2183_v50 = vsel %vm1089_vm10, %v3518_v47, %v2150_v21 }
0x11cc   :  { %v2121_v22 = vpop.permute.xlu1 %2120 }
0x11cd   :  { %v2176_v57 = vsel %vm1089_vm10, %v3520_v49, %v2121_v22 }
0x11ce   :  { %v2154_v23 = vpop.permute.xlu0 %2153 }
0x11cf   :  { %v2184_v53 = vsel %vm472_vm11, %v2183_v50, %v2154_v23 }
0x11d0   :  { %v2125_v24 = vpop.permute.xlu1 %2124 }
0x11d1   :  { %v2177_v60 = vsel %vm472_vm11, %v2176_v57, %v2125_v24 }
0x11d2   :  { %v2158_v25 = vpop.permute.xlu0 %2157 }
0x11d3   :  { %v2185_v58 = vsel %vm1041_vm9, %v2184_v53, %v2158_v25 }
0x11d4   :  { %v2129_v26 = vpop.permute.xlu1 %2128 }
0x11d5   :  { %v2178_v2 = vsel %vm1041_vm9, %v2177_v60, %v2129_v26 }
0x11d6   :  { %v2162_v27 = vpop.permute.xlu0 %2161 }
0x11d7   :  { %v2186_v61 = vsel %vm193_vm6, %v2185_v58, %v2162_v27 }
0x11d8   :  { %v2133_v28 = vpop.permute.xlu1 %2132 }
0x11d9   :  { %v2179_v5 = vsel %vm193_vm6, %v2178_v2, %v2133_v28 }
0x11da   :  { %v2166_v29 = vpop.permute.xlu0 %2165 }
0x11dc   :  { %v2137_v30 = vpop.permute.xlu1 %2136 }
0x11dd   :  { %v2180_v8 = vsel %vm1478_vm15, %v2179_v5, %v2137_v30 }
0x11de   :  { %v2170_v31 = vpop.permute.xlu0 %2169 }
0x11e0   :  { %v2141_v32 = vpop.permute.xlu1 %2140 }
0x11e1   :  { %v2181_v10 = vsel %vm802_vm3, %v2180_v8, %v2141_v32 }
0x11e2   :  { %v2222_v33 = vpop.permute.xlu0 %2221 }
0x11e3   :  { %v2255_v43 = vsel %vm1089_vm10, %v3541_v1, %v2222_v33 }
0x11e4   :  { %v2193_v34 = vpop.permute.xlu1 %2192 }
0x11e5   :  { %v2248_v44 = vsel %vm1089_vm10, %v2116_v3, %v2193_v34  ;;  %v2187_v3 = vsel %vm1478_vm15, %v2186_v61, %v2166_v29 }
0x11e6   :  { %v2226_v35 = vpop.permute.xlu0 %2225  ;;  %v2188_v6 = vsel %vm802_vm3, %v2187_v3, %v2170_v31 }
0x11e7   :  { %v2256_v45 = vsel %vm472_vm11, %v2255_v43, %v2226_v35 }
0x11e8   :  { %v2197_v36 = vpop.permute.xlu1 %2196 }
0x11e9   :  { %v2249_v46 = vsel %vm472_vm11, %v2248_v44, %v2197_v36 }
0x11ea   :  { %v2230_v0 = vpop.permute.xlu0 %2229 }
0x11eb   :  { %v2257_v51 = vsel %vm1041_vm9, %v2256_v45, %v2230_v0 }
0x11ec   :  { %v2201_v37 = vpop.permute.xlu1 %2200 }
0x11ed   :  { %v2250_v52 = vsel %vm1041_vm9, %v2249_v46, %v2201_v37 }
0x11ee   :  { %v2234_v38 = vpop.permute.xlu0 %2233 }
0x11ef   :  { %v2258_v54 = vsel %vm193_vm6, %v2257_v51, %v2234_v38 }
0x11f0   :  { %v2205_v39 = vpop.permute.xlu1 %2204 }
0x11f1   :  { %v2251_v55 = vsel %vm193_vm6, %v2250_v52, %v2205_v39 }
0x11f2   :  { %v2238_v40 = vpop.permute.xlu0 %2237 }
0x11f3   :  { %v2259_v59 = vsel %vm1478_vm15, %v2258_v54, %v2238_v40 }
0x11f4   :  { %v2209_v41 = vpop.permute.xlu1 %2208 }
0x11f5   :  { %v2252_v47 = vsel %vm1478_vm15, %v2251_v55, %v2209_v41 }
0x11f6   :  { %v2242_v42 = vpop.permute.xlu0 %2241 }
0x11f7   :  { %v2260_v62 = vsel %vm802_vm3, %v2259_v59, %v2242_v42 }
0x11f8   :  { %v2213_v48 = vpop.permute.xlu1 %2212 }
0x11f9   :  { %v2253_v63 = vsel %vm802_vm3, %v2252_v47, %v2213_v48 }
0x11fa   :  { %v2246_v56 = vpop.permute.xlu0 %2245 }
0x11fb   :  { %v2261_v49 = vsel %vm1559_vm14, %v2260_v62, %v2246_v56 }
0x11fc   :  { %v2217_v1 = vpop.permute.xlu1 %2216  ;;  %v2265_v11 = vrot.slane %v2261_v49, 7 }
0x11fd   :  { %v2254_v4 = vsel %vm1559_vm14, %v2253_v63, %v2217_v1 }
0x11fe   :  { %v2174_v7 = vpop.permute.xlu0 %2173  ;;  %v2264_v12 = vrot.slane %v2254_v4, 7 }
0x11ff   :  { %v2189_v9 = vsel %vm1559_vm14, %v2188_v6, %v2174_v7 }
0x1200   :  { %v2145_v13 = vpop.permute.xlu1 %2144  ;;  %v2270_v15 = vsel %vm2268_vm0, %v2189_v9, %v2265_v11 }
0x1201   :  { %v2182_v14 = vsel %vm1559_vm14, %v2181_v10, %v2145_v13 }
0x1202   :  { %v2269_v16 = vsel %vm2268_vm0, %v2182_v14, %v2264_v12 }
0x1203   :  { %v2273_v17 = vcombine.low %v2269_v16, %v2270_v15 }
0x1205   :  { %2328 = vst.sshfl [vmem:[%s3634_s27] sm:$0x33 pattern:$0x76325410] %v2273_v17 }

</bundles_post_ra>
